<compile_context>
chip_gen: v7x
topology: tpu7x:2x2x1
jax: 0.10.0
libtpu: 0.0.40
codegen_flags: <defaults>
</compile_context>

<pallas_src>
import math

import jax
import jax.numpy as jnp
from jax import lax
from jax.experimental import pallas as pl
from jax.experimental.pallas import tpu as pltpu

# Small, module-consistent shapes.
B, S, D = 2, 8, 32          # batch, max_seq_len, d_model
H = 4                       # attention heads
DH = D // H                 # head dim
DFF = 64                    # feed-forward hidden dim
MT = B * S                  # batch folded into the matmul M dim
EPS = 1e-6
SCALE = 1.0 / math.sqrt(DH)
NEG_INF = -1e9

# Weight slab layout: (64, 896) bf16, 128-lane-aligned column banks.
W_ROWS, W_COLS = 64, 896
C_SA_QKV, C_CA_Q, C_CA_KV, C_SA_O, C_CA_O, C_FF1, C_FF2 = 0, 128, 256, 384, 512, 640, 768

# Misc slab layout: (40, 128) f32 -- biases (rows 0..6) + additive masks (rows 8..39).
M_ROWS, M_COLS = 40, 128
R_BSA_QKV, R_BCA_Q, R_BCA_KV, R_BSA_O, R_BCA_O, R_B1, R_B2 = 0, 1, 2, 3, 4, 5, 6
R_MSELF, R_MCROSS = 8, 8 + MT


# ----------------------------- kernel helpers ------------------------------

def _norm(x):
    # Un-affine LayerNorm (gamma/beta are folded into downstream weights host-side).
    mu = jnp.mean(x, axis=-1, keepdims=True)
    var = jnp.mean((x - mu) ** 2, axis=-1, keepdims=True)
    return (x - mu) * lax.rsqrt(var + EPS)


def _heads(z16):
    # (MT, D) bf16 -> (H, MT, DH) via static lane slices (no in-kernel transpose).
    return jnp.concatenate(
        [z16[None, :, h * DH:(h + 1) * DH] for h in range(H)], axis=0)


def _merge_heads(o):
    # (H, MT, DH) f32 -> (MT, D): static leading-axis picks + lane concat.
    return jnp.concatenate([o[h] for h in range(H)], axis=-1)


def _attend(q, k, v, wo16, bo, bias):
    # q/k/v: (MT, D) f32 (q already carries 1/sqrt(DH)); wo16: (D, D) bf16;
    # bo: (1, D) f32; bias: (MT, MT) additive mask (broadcast over heads).
    qh = _heads(q.astype(jnp.bfloat16))
    kh = _heads(k.astype(jnp.bfloat16))
    vh = _heads(v.astype(jnp.bfloat16))
    s = jnp.einsum("hqd,hkd->hqk", qh, kh, preferred_element_type=jnp.float32)
    s = s + bias
    s = s - jnp.max(s, axis=-1, keepdims=True)          # softmax in f32
    p = jnp.exp(s)
    p = p * pl.reciprocal(jnp.sum(p, axis=-1, keepdims=True), approx=True)
    o = jnp.einsum("hqk,hkd->hqd", p.astype(jnp.bfloat16), vh,
                   preferred_element_type=jnp.float32)
    o16 = _merge_heads(o).astype(jnp.bfloat16)           # (MT, D)
    return jnp.dot(o16, wo16, preferred_element_type=jnp.float32) + bo


def decoder_kernel(xe_ref, w_ref, misc_ref, o_ref):
    x = xe_ref[0:MT, :]                                  # (MT, D) f32
    enc16 = xe_ref[MT:2 * MT, :].astype(jnp.bfloat16)    # (MT, D) bf16 (matmul operand)

    m_self = misc_ref[R_MSELF:R_MSELF + MT, 0:MT]        # (MT, MT) additive biases
    m_cross = misc_ref[R_MCROSS:R_MCROSS + MT, 0:MT]

    # res_conns[0]: x + self_attention(LN0(x), ..., tgt_mask)
    # (LN0 gamma/beta and 1/sqrt(DH) are folded into the QKV weights/biases.)
    xn16 = _norm(x).astype(jnp.bfloat16)
    qkv = (jnp.dot(xn16, w_ref[0:D, C_SA_QKV:C_SA_QKV + 3 * D],
                   preferred_element_type=jnp.float32)
           + misc_ref[R_BSA_QKV:R_BSA_QKV + 1, 0:3 * D])
    x = x + _attend(qkv[:, 0:D], qkv[:, D:2 * D], qkv[:, 2 * D:3 * D],
                    w_ref[0:D, C_SA_O:C_SA_O + D],
                    misc_ref[R_BSA_O:R_BSA_O + 1, 0:D], m_self)

    # res_conns[1]: x + cross_attention(LN1(x), enc, enc, src_mask)
    xn16 = _norm(x).astype(jnp.bfloat16)
    q = (jnp.dot(xn16, w_ref[0:D, C_CA_Q:C_CA_Q + D],
                 preferred_element_type=jnp.float32)
         + misc_ref[R_BCA_Q:R_BCA_Q + 1, 0:D])
    kv = (jnp.dot(enc16, w_ref[0:D, C_CA_KV:C_CA_KV + 2 * D],
                  preferred_element_type=jnp.float32)
          + misc_ref[R_BCA_KV:R_BCA_KV + 1, 0:2 * D])
    x = x + _attend(q, kv[:, 0:D], kv[:, D:2 * D],
                    w_ref[0:D, C_CA_O:C_CA_O + D],
                    misc_ref[R_BCA_O:R_BCA_O + 1, 0:D], m_cross)

    # res_conns[2]: x + feed_forward(LN2(x))   (LN2 folded into W1/b1)
    xn16 = _norm(x).astype(jnp.bfloat16)
    h = (jnp.dot(xn16, w_ref[0:D, C_FF1:C_FF1 + DFF],
                 preferred_element_type=jnp.float32)
         + misc_ref[R_B1:R_B1 + 1, 0:DFF])
    h16 = jnp.maximum(h, 0.0).astype(jnp.bfloat16)
    ff = (jnp.dot(h16, w_ref[0:DFF, C_FF2:C_FF2 + D],
                  preferred_element_type=jnp.float32)
          + misc_ref[R_B2:R_B2 + 1, 0:D])
    o_ref[...] = x + ff


# ------------------------------ host wrapper -------------------------------

def _mask_biases(src_mask, tgt_mask):
    # Flattened (B*S) attention: block-diagonal "same batch" structure + optional
    # causal mask inside each block, as additive -1e9 biases.
    del src_mask  # True -> full attention within the same batch element
    r = jnp.arange(MT, dtype=jnp.int32)
    same = (r[:, None] // S) == (r[None, :] // S)
    keep_self = same & (r[None, :] <= r[:, None]) if tgt_mask else same
    to_bias = lambda keep: jnp.where(keep, 0.0, NEG_INF).astype(jnp.float32)
    return to_bias(keep_self), to_bias(same)


def pack_params(p, src_mask=True, tgt_mask=True):
    """One-time host-side repack: fold LN gamma/beta + 1/sqrt(DH) into the
    projection weights/biases and collapse everything into 2 lane-dense slabs."""
    g, be = p["lng"], p["lnb"]

    wq, wk, wv, wo_sa = (p["wsa"][i] for i in range(4))
    bq, bk, bv, bo_sa = (p["bsa"][i] for i in range(4))
    w_sa_qkv = jnp.concatenate(
        [g[0][:, None] * wq * SCALE, g[0][:, None] * wk, g[0][:, None] * wv], axis=1)
    b_sa_qkv = jnp.concatenate(
        [(be[0] @ wq + bq) * SCALE, be[0] @ wk + bk, be[0] @ wv + bv], axis=0)

    wq2, wk2, wv2, wo_ca = (p["wca"][i] for i in range(4))
    bq2, bk2, bv2, bo_ca = (p["bca"][i] for i in range(4))
    w_ca_q = g[1][:, None] * wq2 * SCALE
    b_ca_q = (be[1] @ wq2 + bq2) * SCALE
    w_ca_kv = jnp.concatenate([wk2, wv2], axis=1)
    b_ca_kv = jnp.concatenate([bk2, bv2], axis=0)

    w1 = g[2][:, None] * p["w1"]
    b1 = be[2] @ p["w1"] + p["b1"].reshape(-1)
    w2 = p["w2"]
    b2 = p["b2"].reshape(-1)

    wslab = jnp.zeros((W_ROWS, W_COLS), jnp.float32)
    wslab = wslab.at[0:D, C_SA_QKV:C_SA_QKV + 3 * D].set(w_sa_qkv)
    wslab = wslab.at[0:D, C_CA_Q:C_CA_Q + D].set(w_ca_q)
    wslab = wslab.at[0:D, C_CA_KV:C_CA_KV + 2 * D].set(w_ca_kv)
    wslab = wslab.at[0:D, C_SA_O:C_SA_O + D].set(wo_sa)
    wslab = wslab.at[0:D, C_CA_O:C_CA_O + D].set(wo_ca)
    wslab = wslab.at[0:D, C_FF1:C_FF1 + DFF].set(w1)
    wslab = wslab.at[0:DFF, C_FF2:C_FF2 + D].set(w2)
    wslab = wslab.astype(jnp.bfloat16)

    misc = jnp.zeros((M_ROWS, M_COLS), jnp.float32)
    misc = misc.at[R_BSA_QKV, 0:3 * D].set(b_sa_qkv)
    misc = misc.at[R_BCA_Q, 0:D].set(b_ca_q)
    misc = misc.at[R_BCA_KV, 0:2 * D].set(b_ca_kv)
    misc = misc.at[R_BSA_O, 0:D].set(bo_sa)
    misc = misc.at[R_BCA_O, 0:D].set(bo_ca)
    misc = misc.at[R_B1, 0:DFF].set(b1)
    misc = misc.at[R_B2, 0:D].set(b2)
    m_self, m_cross = _mask_biases(src_mask, bool(tgt_mask))
    misc = misc.at[R_MSELF:R_MSELF + MT, 0:MT].set(m_self)
    misc = misc.at[R_MCROSS:R_MCROSS + MT, 0:MT].set(m_cross)

    return wslab, misc


@jax.jit
def decoder_forward(x, enc, wslab, misc):
    # Stack x and encoder_output into one activation slab (single input DMA).
    xe = jnp.concatenate([x.reshape(MT, D), enc.reshape(MT, D)],
                         axis=0).astype(jnp.float32)
    vmem = pl.BlockSpec(memory_space=pltpu.MemorySpace.VMEM)
    out = pl.pallas_call(
        decoder_kernel,
        out_shape=jax.ShapeDtypeStruct((MT, D), jnp.float32),
        in_specs=[vmem, vmem, vmem],
        out_specs=vmem,
    )(xe, wslab, misc)
    return out.reshape(B, S, D)


# ----------------------- pure-JAX reference (checking) ----------------------

def _ref_ln(x, g, b):
    mu = jnp.mean(x, axis=-1, keepdims=True)
    var = jnp.mean((x - mu) ** 2, axis=-1, keepdims=True)
    return g * (x - mu) / jnp.sqrt(var + EPS) + b


def _ref_mha(q_in, k_in, v_in, w, b, causal):
    q = q_in @ w[0] + b[0]
    k = k_in @ w[1] + b[1]
    v = v_in @ w[2] + b[2]
    Bn, Sn, _ = q.shape
    q = q.reshape(Bn, Sn, H, DH).transpose(0, 2, 1, 3)
    k = k.reshape(Bn, Sn, H, DH).transpose(0, 2, 1, 3)
    v = v.reshape(Bn, Sn, H, DH).transpose(0, 2, 1, 3)
    s = jnp.einsum("bhqd,bhkd->bhqk", q, k) * SCALE
    if causal:
        mask = jnp.tril(jnp.ones((Sn, Sn), bool))
        s = jnp.where(mask, s, NEG_INF)
    p = jax.nn.softmax(s, axis=-1)
    o = jnp.einsum("bhqk,bhkd->bhqd", p, v)
    o = o.transpose(0, 2, 1, 3).reshape(Bn, Sn, D)
    return o @ w[3] + b[3]


def decoder_reference(x, enc, p, tgt_mask=True):
    xn = _ref_ln(x, p["lng"][0], p["lnb"][0])
    x = x + _ref_mha(xn, xn, xn, p["wsa"], p["bsa"], causal=bool(tgt_mask))
    xn = _ref_ln(x, p["lng"][1], p["lnb"][1])
    x = x + _ref_mha(xn, enc, enc, p["wca"], p["bca"], causal=False)
    xn = _ref_ln(x, p["lng"][2], p["lnb"][2])
    ff = jnp.maximum(xn @ p["w1"] + p["b1"], 0.0) @ p["w2"] + p["b2"]
    return x + ff


# ------------------------------ params & main ------------------------------

def init_params(key):
    ks = jax.random.split(key, 10)
    std = 0.02
    return {
        "wsa": std * jax.random.normal(ks[0], (4, D, D), jnp.float32),
        "bsa": std * jax.random.normal(ks[1], (4, D), jnp.float32),
        "wca": std * jax.random.normal(ks[2], (4, D, D), jnp.float32),
        "bca": std * jax.random.normal(ks[3], (4, D), jnp.float32),
        "w1":  std * jax.random.normal(ks[4], (D, DFF), jnp.float32),
        "b1":  std * jax.random.normal(ks[5], (1, DFF), jnp.float32),
        "w2":  std * jax.random.normal(ks[6], (DFF, D), jnp.float32),
        "b2":  std * jax.random.normal(ks[7], (1, D), jnp.float32),
        # Non-trivial LayerNorm affine params so the gamma/beta fold is exercised.
        "lng": 1.0 + 0.1 * jax.random.normal(ks[8], (3, D), jnp.float32),
        "lnb": 0.05 * jax.random.normal(ks[9], (3, D), jnp.float32),
    }


if __name__ == "__main__":
    key = jax.random.PRNGKey(0)
    kx, ke, kp = jax.random.split(key, 3)
    x = jax.random.normal(kx, (B, S, D), jnp.float32)
    enc = jax.random.normal(ke, (B, S, D), jnp.float32)
    params = init_params(kp)

    # Hoisted one-time repack (weights/biases/LN/masks -> 2 packed slabs).
    wslab, misc = pack_params(params, src_mask=True, tgt_mask=True)

    out = decoder_forward(x, enc, wslab, misc)
    out = jax.block_until_ready(out)

    ref = decoder_reference(x, enc, params, tgt_mask=True)
    assert out.shape == (B, S, D)
    # Tolerance accounts for bf16 MXU inputs + approx EUP reciprocal vs f32 reference.
    if not bool(jnp.allclose(out, ref, atol=5e-3, rtol=5e-3)):
        err = float(jnp.max(jnp.abs(out - ref)))
        raise SystemExit(f"Pallas kernel does not match JAX reference (max abs err {err:.3e})")
    print("KERNEL_OK")
</pallas_src>

<mosaic_0001>
module attributes {stable_mosaic.version = 11 : i64} {
  func.func @decoder_kernel(%arg0: memref<32x32xf32, #tpu.memory_space<vmem>>, %arg1: memref<64x896xbf16, #tpu.memory_space<vmem>>, %arg2: memref<40x128xf32, #tpu.memory_space<vmem>>, %arg3: memref<16x32xf32, #tpu.memory_space<vmem>>) attributes {dimension_semantics = [], scalar_prefetch = 0 : i64, scratch_operands = 0 : i64, tpu.core_type = #tpu.core_type<tc>} {
    %c0 = arith.constant 0 : index
    %c0_0 = arith.constant 0 : index
    %0 = vector.load %arg0[%c0, %c0_0] : memref<32x32xf32, #tpu.memory_space<vmem>>, vector<16x32xf32>
    %c16 = arith.constant 16 : index
    %c0_1 = arith.constant 0 : index
    %1 = vector.load %arg0[%c16, %c0_1] : memref<32x32xf32, #tpu.memory_space<vmem>>, vector<16x32xf32>
    %2 = arith.truncf %1 : vector<16x32xf32> to vector<16x32xbf16>
    %c8 = arith.constant 8 : index
    %c0_2 = arith.constant 0 : index
    %3 = vector.load %arg2[%c8, %c0_2] : memref<40x128xf32, #tpu.memory_space<vmem>>, vector<16x16xf32>
    %c24 = arith.constant 24 : index
    %c0_3 = arith.constant 0 : index
    %4 = vector.load %arg2[%c24, %c0_3] : memref<40x128xf32, #tpu.memory_space<vmem>>, vector<16x16xf32>
    %cst = arith.constant dense<0.000000e+00> : vector<16xf32>
    %5 = vector.multi_reduction <add>, %0, %cst [1] : vector<16x32xf32> to vector<16xf32>
    %6 = vector.shape_cast %5 : vector<16xf32> to vector<16x1xf32>
    %cst_4 = arith.constant 3.200000e+01 : f32
    %7 = vector.broadcast %cst_4 : f32 to vector<16x1xf32>
    %8 = arith.divf %6, %7 : vector<16x1xf32>
    %9 = vector.broadcast %8 : vector<16x1xf32> to vector<16x32xf32>
    %10 = arith.subf %0, %9 : vector<16x32xf32>
    %11 = arith.mulf %10, %10 : vector<16x32xf32>
    %cst_5 = arith.constant dense<0.000000e+00> : vector<16xf32>
    %12 = vector.multi_reduction <add>, %11, %cst_5 [1] : vector<16x32xf32> to vector<16xf32>
    %13 = vector.shape_cast %12 : vector<16xf32> to vector<16x1xf32>
    %cst_6 = arith.constant 3.200000e+01 : f32
    %14 = vector.broadcast %cst_6 : f32 to vector<16x1xf32>
    %15 = arith.divf %13, %14 : vector<16x1xf32>
    %16 = vector.broadcast %8 : vector<16x1xf32> to vector<16x32xf32>
    %17 = arith.subf %0, %16 : vector<16x32xf32>
    %cst_7 = arith.constant 9.99999997E-7 : f32
    %18 = vector.broadcast %cst_7 : f32 to vector<16x1xf32>
    %19 = arith.addf %15, %18 : vector<16x1xf32>
    %20 = math.rsqrt %19 : vector<16x1xf32>
    %21 = vector.broadcast %20 : vector<16x1xf32> to vector<16x32xf32>
    %22 = arith.mulf %17, %21 : vector<16x32xf32>
    %23 = arith.truncf %22 : vector<16x32xf32> to vector<16x32xbf16>
    %c0_8 = arith.constant 0 : index
    %c0_9 = arith.constant 0 : index
    %24 = vector.load %arg1[%c0_8, %c0_9] : memref<64x896xbf16, #tpu.memory_space<vmem>>, vector<32x96xbf16>
    %cst_10 = arith.constant dense<0.000000e+00> : vector<16x96xf32>
    %25 = tpu.matmul %23, %24, %cst_10 {dimension_numbers = #tpu.dot_dimension_numbers<[1], [0], [0], [1], [0, 0, 1, 1], [], []>} : vector<16x32xbf16>, vector<32x96xbf16>, vector<16x96xf32> -> vector<16x96xf32>
    %c0_11 = arith.constant 0 : index
    %c0_12 = arith.constant 0 : index
    %26 = vector.load %arg2[%c0_11, %c0_12] : memref<40x128xf32, #tpu.memory_space<vmem>>, vector<1x96xf32>
    %27 = vector.broadcast %26 : vector<1x96xf32> to vector<16x96xf32>
    %28 = arith.addf %25, %27 : vector<16x96xf32>
    %29 = vector.extract_strided_slice %28 {offsets = [0, 0], sizes = [16, 32], strides = [1, 1]} : vector<16x96xf32> to vector<16x32xf32>
    %30 = vector.extract_strided_slice %28 {offsets = [0, 32], sizes = [16, 32], strides = [1, 1]} : vector<16x96xf32> to vector<16x32xf32>
    %31 = vector.extract_strided_slice %28 {offsets = [0, 64], sizes = [16, 32], strides = [1, 1]} : vector<16x96xf32> to vector<16x32xf32>
    %c0_13 = arith.constant 0 : index
    %c384 = arith.constant 384 : index
    %32 = vector.load %arg1[%c0_13, %c384] : memref<64x896xbf16, #tpu.memory_space<vmem>>, vector<32x32xbf16>
    %c3 = arith.constant 3 : index
    %c0_14 = arith.constant 0 : index
    %33 = vector.load %arg2[%c3, %c0_14] : memref<40x128xf32, #tpu.memory_space<vmem>>, vector<1x32xf32>
    %34 = arith.truncf %29 : vector<16x32xf32> to vector<16x32xbf16>
    %35 = vector.extract_strided_slice %34 {offsets = [0, 0], sizes = [16, 8], strides = [1, 1]} : vector<16x32xbf16> to vector<16x8xbf16>
    %36 = vector.shape_cast %35 : vector<16x8xbf16> to vector<1x16x8xbf16>
    %37 = vector.extract_strided_slice %34 {offsets = [0, 8], sizes = [16, 8], strides = [1, 1]} : vector<16x32xbf16> to vector<16x8xbf16>
    %38 = vector.shape_cast %37 : vector<16x8xbf16> to vector<1x16x8xbf16>
    %39 = vector.extract_strided_slice %34 {offsets = [0, 16], sizes = [16, 8], strides = [1, 1]} : vector<16x32xbf16> to vector<16x8xbf16>
    %40 = vector.shape_cast %39 : vector<16x8xbf16> to vector<1x16x8xbf16>
    %41 = vector.extract_strided_slice %34 {offsets = [0, 24], sizes = [16, 8], strides = [1, 1]} : vector<16x32xbf16> to vector<16x8xbf16>
    %42 = vector.shape_cast %41 : vector<16x8xbf16> to vector<1x16x8xbf16>
    %43 = tpu.concatenate %36, %38, %40, %42 in 0 : vector<1x16x8xbf16>, vector<1x16x8xbf16>, vector<1x16x8xbf16>, vector<1x16x8xbf16> -> vector<4x16x8xbf16>
    %44 = arith.truncf %30 : vector<16x32xf32> to vector<16x32xbf16>
    %45 = vector.extract_strided_slice %44 {offsets = [0, 0], sizes = [16, 8], strides = [1, 1]} : vector<16x32xbf16> to vector<16x8xbf16>
    %46 = vector.shape_cast %45 : vector<16x8xbf16> to vector<1x16x8xbf16>
    %47 = vector.extract_strided_slice %44 {offsets = [0, 8], sizes = [16, 8], strides = [1, 1]} : vector<16x32xbf16> to vector<16x8xbf16>
    %48 = vector.shape_cast %47 : vector<16x8xbf16> to vector<1x16x8xbf16>
    %49 = vector.extract_strided_slice %44 {offsets = [0, 16], sizes = [16, 8], strides = [1, 1]} : vector<16x32xbf16> to vector<16x8xbf16>
    %50 = vector.shape_cast %49 : vector<16x8xbf16> to vector<1x16x8xbf16>
    %51 = vector.extract_strided_slice %44 {offsets = [0, 24], sizes = [16, 8], strides = [1, 1]} : vector<16x32xbf16> to vector<16x8xbf16>
    %52 = vector.shape_cast %51 : vector<16x8xbf16> to vector<1x16x8xbf16>
    %53 = tpu.concatenate %46, %48, %50, %52 in 0 : vector<1x16x8xbf16>, vector<1x16x8xbf16>, vector<1x16x8xbf16>, vector<1x16x8xbf16> -> vector<4x16x8xbf16>
    %54 = arith.truncf %31 : vector<16x32xf32> to vector<16x32xbf16>
    %55 = vector.extract_strided_slice %54 {offsets = [0, 0], sizes = [16, 8], strides = [1, 1]} : vector<16x32xbf16> to vector<16x8xbf16>
    %56 = vector.shape_cast %55 : vector<16x8xbf16> to vector<1x16x8xbf16>
    %57 = vector.extract_strided_slice %54 {offsets = [0, 8], sizes = [16, 8], strides = [1, 1]} : vector<16x32xbf16> to vector<16x8xbf16>
    %58 = vector.shape_cast %57 : vector<16x8xbf16> to vector<1x16x8xbf16>
    %59 = vector.extract_strided_slice %54 {offsets = [0, 16], sizes = [16, 8], strides = [1, 1]} : vector<16x32xbf16> to vector<16x8xbf16>
    %60 = vector.shape_cast %59 : vector<16x8xbf16> to vector<1x16x8xbf16>
    %61 = vector.extract_strided_slice %54 {offsets = [0, 24], sizes = [16, 8], strides = [1, 1]} : vector<16x32xbf16> to vector<16x8xbf16>
    %62 = vector.shape_cast %61 : vector<16x8xbf16> to vector<1x16x8xbf16>
    %63 = tpu.concatenate %56, %58, %60, %62 in 0 : vector<1x16x8xbf16>, vector<1x16x8xbf16>, vector<1x16x8xbf16>, vector<1x16x8xbf16> -> vector<4x16x8xbf16>
    "tpu.trace_start"() <{level = 10 : i32, message = "hqd,hkd->hqk"}> : () -> ()
    %cst_15 = arith.constant dense<0.000000e+00> : vector<4x16x16xf32>
    %64 = tpu.matmul %43, %53, %cst_15 {dimension_numbers = #tpu.dot_dimension_numbers<[2], [2], [1], [1], [0, 0, 0, 1, 1, 1], [0], [0]>} : vector<4x16x8xbf16>, vector<4x16x8xbf16>, vector<4x16x16xf32> -> vector<4x16x16xf32>
    "tpu.trace_stop"() : () -> ()
    %65 = vector.shape_cast %3 : vector<16x16xf32> to vector<1x16x16xf32>
    %66 = vector.broadcast %65 : vector<1x16x16xf32> to vector<4x16x16xf32>
    %67 = arith.addf %64, %66 : vector<4x16x16xf32>
    %cst_16 = arith.constant dense<0xFF800000> : vector<4x16xf32>
    %68 = vector.multi_reduction <maximumf>, %67, %cst_16 [2] : vector<4x16x16xf32> to vector<4x16xf32>
    %69 = vector.shape_cast %68 : vector<4x16xf32> to vector<4x16x1xf32>
    %70 = vector.broadcast %69 : vector<4x16x1xf32> to vector<4x16x16xf32>
    %71 = arith.subf %67, %70 : vector<4x16x16xf32>
    %72 = math.exp %71 : vector<4x16x16xf32>
    %cst_17 = arith.constant dense<0.000000e+00> : vector<4x16xf32>
    %73 = vector.multi_reduction <add>, %72, %cst_17 [2] : vector<4x16x16xf32> to vector<4x16xf32>
    %74 = vector.shape_cast %73 : vector<4x16xf32> to vector<4x16x1xf32>
    %75 = tpu.reciprocal %74 {approx = true} : vector<4x16x1xf32> -> vector<4x16x1xf32>
    %76 = vector.broadcast %75 : vector<4x16x1xf32> to vector<4x16x16xf32>
    %77 = arith.mulf %72, %76 : vector<4x16x16xf32>
    %78 = arith.truncf %77 : vector<4x16x16xf32> to vector<4x16x16xbf16>
    "tpu.trace_start"() <{level = 10 : i32, message = "hqk,hkd->hqd"}> : () -> ()
    %cst_18 = arith.constant dense<0.000000e+00> : vector<4x16x8xf32>
    %79 = tpu.matmul %78, %63, %cst_18 {dimension_numbers = #tpu.dot_dimension_numbers<[2], [1], [1], [2], [0, 0, 0, 1, 1, 2], [0], [0]>} : vector<4x16x16xbf16>, vector<4x16x8xbf16>, vector<4x16x8xf32> -> vector<4x16x8xf32>
    "tpu.trace_stop"() : () -> ()
    %80 = vector.extract_strided_slice %79 {offsets = [0, 0, 0], sizes = [1, 16, 8], strides = [1, 1, 1]} : vector<4x16x8xf32> to vector<1x16x8xf32>
    %81 = vector.shape_cast %80 : vector<1x16x8xf32> to vector<16x8xf32>
    %82 = vector.extract_strided_slice %79 {offsets = [1, 0, 0], sizes = [1, 16, 8], strides = [1, 1, 1]} : vector<4x16x8xf32> to vector<1x16x8xf32>
    %83 = vector.shape_cast %82 : vector<1x16x8xf32> to vector<16x8xf32>
    %84 = vector.extract_strided_slice %79 {offsets = [2, 0, 0], sizes = [1, 16, 8], strides = [1, 1, 1]} : vector<4x16x8xf32> to vector<1x16x8xf32>
    %85 = vector.shape_cast %84 : vector<1x16x8xf32> to vector<16x8xf32>
    %86 = vector.extract_strided_slice %79 {offsets = [3, 0, 0], sizes = [1, 16, 8], strides = [1, 1, 1]} : vector<4x16x8xf32> to vector<1x16x8xf32>
    %87 = vector.shape_cast %86 : vector<1x16x8xf32> to vector<16x8xf32>
    %88 = tpu.concatenate %81, %83, %85, %87 in 1 : vector<16x8xf32>, vector<16x8xf32>, vector<16x8xf32>, vector<16x8xf32> -> vector<16x32xf32>
    %89 = arith.truncf %88 : vector<16x32xf32> to vector<16x32xbf16>
    %cst_19 = arith.constant dense<0.000000e+00> : vector<16x32xf32>
    %90 = tpu.matmul %89, %32, %cst_19 {dimension_numbers = #tpu.dot_dimension_numbers<[1], [0], [0], [1], [0, 0, 1, 1], [], []>} : vector<16x32xbf16>, vector<32x32xbf16>, vector<16x32xf32> -> vector<16x32xf32>
    %91 = vector.broadcast %33 : vector<1x32xf32> to vector<16x32xf32>
    %92 = arith.addf %90, %91 : vector<16x32xf32>
    %93 = arith.addf %0, %92 : vector<16x32xf32>
    %cst_20 = arith.constant dense<0.000000e+00> : vector<16xf32>
    %94 = vector.multi_reduction <add>, %93, %cst_20 [1] : vector<16x32xf32> to vector<16xf32>
    %95 = vector.shape_cast %94 : vector<16xf32> to vector<16x1xf32>
    %cst_21 = arith.constant 3.200000e+01 : f32
    %96 = vector.broadcast %cst_21 : f32 to vector<16x1xf32>
    %97 = arith.divf %95, %96 : vector<16x1xf32>
    %98 = vector.broadcast %97 : vector<16x1xf32> to vector<16x32xf32>
    %99 = arith.subf %93, %98 : vector<16x32xf32>
    %100 = arith.mulf %99, %99 : vector<16x32xf32>
    %cst_22 = arith.constant dense<0.000000e+00> : vector<16xf32>
    %101 = vector.multi_reduction <add>, %100, %cst_22 [1] : vector<16x32xf32> to vector<16xf32>
    %102 = vector.shape_cast %101 : vector<16xf32> to vector<16x1xf32>
    %cst_23 = arith.constant 3.200000e+01 : f32
    %103 = vector.broadcast %cst_23 : f32 to vector<16x1xf32>
    %104 = arith.divf %102, %103 : vector<16x1xf32>
    %105 = vector.broadcast %97 : vector<16x1xf32> to vector<16x32xf32>
    %106 = arith.subf %93, %105 : vector<16x32xf32>
    %cst_24 = arith.constant 9.99999997E-7 : f32
    %107 = vector.broadcast %cst_24 : f32 to vector<16x1xf32>
    %108 = arith.addf %104, %107 : vector<16x1xf32>
    %109 = math.rsqrt %108 : vector<16x1xf32>
    %110 = vector.broadcast %109 : vector<16x1xf32> to vector<16x32xf32>
    %111 = arith.mulf %106, %110 : vector<16x32xf32>
    %112 = arith.truncf %111 : vector<16x32xf32> to vector<16x32xbf16>
    %c0_25 = arith.constant 0 : index
    %c128 = arith.constant 128 : index
    %113 = vector.load %arg1[%c0_25, %c128] : memref<64x896xbf16, #tpu.memory_space<vmem>>, vector<32x32xbf16>
    %cst_26 = arith.constant dense<0.000000e+00> : vector<16x32xf32>
    %114 = tpu.matmul %112, %113, %cst_26 {dimension_numbers = #tpu.dot_dimension_numbers<[1], [0], [0], [1], [0, 0, 1, 1], [], []>} : vector<16x32xbf16>, vector<32x32xbf16>, vector<16x32xf32> -> vector<16x32xf32>
    %c1 = arith.constant 1 : index
    %c0_27 = arith.constant 0 : index
    %115 = vector.load %arg2[%c1, %c0_27] : memref<40x128xf32, #tpu.memory_space<vmem>>, vector<1x32xf32>
    %116 = vector.broadcast %115 : vector<1x32xf32> to vector<16x32xf32>
    %117 = arith.addf %114, %116 : vector<16x32xf32>
    %c0_28 = arith.constant 0 : index
    %c256 = arith.constant 256 : index
    %118 = vector.load %arg1[%c0_28, %c256] : memref<64x896xbf16, #tpu.memory_space<vmem>>, vector<32x64xbf16>
    %cst_29 = arith.constant dense<0.000000e+00> : vector<16x64xf32>
    %119 = tpu.matmul %2, %118, %cst_29 {dimension_numbers = #tpu.dot_dimension_numbers<[1], [0], [0], [1], [0, 0, 1, 1], [], []>} : vector<16x32xbf16>, vector<32x64xbf16>, vector<16x64xf32> -> vector<16x64xf32>
    %c2 = arith.constant 2 : index
    %c0_30 = arith.constant 0 : index
    %120 = vector.load %arg2[%c2, %c0_30] : memref<40x128xf32, #tpu.memory_space<vmem>>, vector<1x64xf32>
    %121 = vector.broadcast %120 : vector<1x64xf32> to vector<16x64xf32>
    %122 = arith.addf %119, %121 : vector<16x64xf32>
    %123 = vector.extract_strided_slice %122 {offsets = [0, 0], sizes = [16, 32], strides = [1, 1]} : vector<16x64xf32> to vector<16x32xf32>
    %124 = vector.extract_strided_slice %122 {offsets = [0, 32], sizes = [16, 32], strides = [1, 1]} : vector<16x64xf32> to vector<16x32xf32>
    %c0_31 = arith.constant 0 : index
    %c512 = arith.constant 512 : index
    %125 = vector.load %arg1[%c0_31, %c512] : memref<64x896xbf16, #tpu.memory_space<vmem>>, vector<32x32xbf16>
    %c4 = arith.constant 4 : index
    %c0_32 = arith.constant 0 : index
    %126 = vector.load %arg2[%c4, %c0_32] : memref<40x128xf32, #tpu.memory_space<vmem>>, vector<1x32xf32>
    %127 = arith.truncf %117 : vector<16x32xf32> to vector<16x32xbf16>
    %128 = vector.extract_strided_slice %127 {offsets = [0, 0], sizes = [16, 8], strides = [1, 1]} : vector<16x32xbf16> to vector<16x8xbf16>
    %129 = vector.shape_cast %128 : vector<16x8xbf16> to vector<1x16x8xbf16>
    %130 = vector.extract_strided_slice %127 {offsets = [0, 8], sizes = [16, 8], strides = [1, 1]} : vector<16x32xbf16> to vector<16x8xbf16>
    %131 = vector.shape_cast %130 : vector<16x8xbf16> to vector<1x16x8xbf16>
    %132 = vector.extract_strided_slice %127 {offsets = [0, 16], sizes = [16, 8], strides = [1, 1]} : vector<16x32xbf16> to vector<16x8xbf16>
    %133 = vector.shape_cast %132 : vector<16x8xbf16> to vector<1x16x8xbf16>
    %134 = vector.extract_strided_slice %127 {offsets = [0, 24], sizes = [16, 8], strides = [1, 1]} : vector<16x32xbf16> to vector<16x8xbf16>
    %135 = vector.shape_cast %134 : vector<16x8xbf16> to vector<1x16x8xbf16>
    %136 = tpu.concatenate %129, %131, %133, %135 in 0 : vector<1x16x8xbf16>, vector<1x16x8xbf16>, vector<1x16x8xbf16>, vector<1x16x8xbf16> -> vector<4x16x8xbf16>
    %137 = arith.truncf %123 : vector<16x32xf32> to vector<16x32xbf16>
    %138 = vector.extract_strided_slice %137 {offsets = [0, 0], sizes = [16, 8], strides = [1, 1]} : vector<16x32xbf16> to vector<16x8xbf16>
    %139 = vector.shape_cast %138 : vector<16x8xbf16> to vector<1x16x8xbf16>
    %140 = vector.extract_strided_slice %137 {offsets = [0, 8], sizes = [16, 8], strides = [1, 1]} : vector<16x32xbf16> to vector<16x8xbf16>
    %141 = vector.shape_cast %140 : vector<16x8xbf16> to vector<1x16x8xbf16>
    %142 = vector.extract_strided_slice %137 {offsets = [0, 16], sizes = [16, 8], strides = [1, 1]} : vector<16x32xbf16> to vector<16x8xbf16>
    %143 = vector.shape_cast %142 : vector<16x8xbf16> to vector<1x16x8xbf16>
    %144 = vector.extract_strided_slice %137 {offsets = [0, 24], sizes = [16, 8], strides = [1, 1]} : vector<16x32xbf16> to vector<16x8xbf16>
    %145 = vector.shape_cast %144 : vector<16x8xbf16> to vector<1x16x8xbf16>
    %146 = tpu.concatenate %139, %141, %143, %145 in 0 : vector<1x16x8xbf16>, vector<1x16x8xbf16>, vector<1x16x8xbf16>, vector<1x16x8xbf16> -> vector<4x16x8xbf16>
    %147 = arith.truncf %124 : vector<16x32xf32> to vector<16x32xbf16>
    %148 = vector.extract_strided_slice %147 {offsets = [0, 0], sizes = [16, 8], strides = [1, 1]} : vector<16x32xbf16> to vector<16x8xbf16>
    %149 = vector.shape_cast %148 : vector<16x8xbf16> to vector<1x16x8xbf16>
    %150 = vector.extract_strided_slice %147 {offsets = [0, 8], sizes = [16, 8], strides = [1, 1]} : vector<16x32xbf16> to vector<16x8xbf16>
    %151 = vector.shape_cast %150 : vector<16x8xbf16> to vector<1x16x8xbf16>
    %152 = vector.extract_strided_slice %147 {offsets = [0, 16], sizes = [16, 8], strides = [1, 1]} : vector<16x32xbf16> to vector<16x8xbf16>
    %153 = vector.shape_cast %152 : vector<16x8xbf16> to vector<1x16x8xbf16>
    %154 = vector.extract_strided_slice %147 {offsets = [0, 24], sizes = [16, 8], strides = [1, 1]} : vector<16x32xbf16> to vector<16x8xbf16>
    %155 = vector.shape_cast %154 : vector<16x8xbf16> to vector<1x16x8xbf16>
    %156 = tpu.concatenate %149, %151, %153, %155 in 0 : vector<1x16x8xbf16>, vector<1x16x8xbf16>, vector<1x16x8xbf16>, vector<1x16x8xbf16> -> vector<4x16x8xbf16>
    "tpu.trace_start"() <{level = 10 : i32, message = "hqd,hkd->hqk"}> : () -> ()
    %cst_33 = arith.constant dense<0.000000e+00> : vector<4x16x16xf32>
    %157 = tpu.matmul %136, %146, %cst_33 {dimension_numbers = #tpu.dot_dimension_numbers<[2], [2], [1], [1], [0, 0, 0, 1, 1, 1], [0], [0]>} : vector<4x16x8xbf16>, vector<4x16x8xbf16>, vector<4x16x16xf32> -> vector<4x16x16xf32>
    "tpu.trace_stop"() : () -> ()
    %158 = vector.shape_cast %4 : vector<16x16xf32> to vector<1x16x16xf32>
    %159 = vector.broadcast %158 : vector<1x16x16xf32> to vector<4x16x16xf32>
    %160 = arith.addf %157, %159 : vector<4x16x16xf32>
    %cst_34 = arith.constant dense<0xFF800000> : vector<4x16xf32>
    %161 = vector.multi_reduction <maximumf>, %160, %cst_34 [2] : vector<4x16x16xf32> to vector<4x16xf32>
    %162 = vector.shape_cast %161 : vector<4x16xf32> to vector<4x16x1xf32>
    %163 = vector.broadcast %162 : vector<4x16x1xf32> to vector<4x16x16xf32>
    %164 = arith.subf %160, %163 : vector<4x16x16xf32>
    %165 = math.exp %164 : vector<4x16x16xf32>
    %cst_35 = arith.constant dense<0.000000e+00> : vector<4x16xf32>
    %166 = vector.multi_reduction <add>, %165, %cst_35 [2] : vector<4x16x16xf32> to vector<4x16xf32>
    %167 = vector.shape_cast %166 : vector<4x16xf32> to vector<4x16x1xf32>
    %168 = tpu.reciprocal %167 {approx = true} : vector<4x16x1xf32> -> vector<4x16x1xf32>
    %169 = vector.broadcast %168 : vector<4x16x1xf32> to vector<4x16x16xf32>
    %170 = arith.mulf %165, %169 : vector<4x16x16xf32>
    %171 = arith.truncf %170 : vector<4x16x16xf32> to vector<4x16x16xbf16>
    "tpu.trace_start"() <{level = 10 : i32, message = "hqk,hkd->hqd"}> : () -> ()
    %cst_36 = arith.constant dense<0.000000e+00> : vector<4x16x8xf32>
    %172 = tpu.matmul %171, %156, %cst_36 {dimension_numbers = #tpu.dot_dimension_numbers<[2], [1], [1], [2], [0, 0, 0, 1, 1, 2], [0], [0]>} : vector<4x16x16xbf16>, vector<4x16x8xbf16>, vector<4x16x8xf32> -> vector<4x16x8xf32>
    "tpu.trace_stop"() : () -> ()
    %173 = vector.extract_strided_slice %172 {offsets = [0, 0, 0], sizes = [1, 16, 8], strides = [1, 1, 1]} : vector<4x16x8xf32> to vector<1x16x8xf32>
    %174 = vector.shape_cast %173 : vector<1x16x8xf32> to vector<16x8xf32>
    %175 = vector.extract_strided_slice %172 {offsets = [1, 0, 0], sizes = [1, 16, 8], strides = [1, 1, 1]} : vector<4x16x8xf32> to vector<1x16x8xf32>
    %176 = vector.shape_cast %175 : vector<1x16x8xf32> to vector<16x8xf32>
    %177 = vector.extract_strided_slice %172 {offsets = [2, 0, 0], sizes = [1, 16, 8], strides = [1, 1, 1]} : vector<4x16x8xf32> to vector<1x16x8xf32>
    %178 = vector.shape_cast %177 : vector<1x16x8xf32> to vector<16x8xf32>
    %179 = vector.extract_strided_slice %172 {offsets = [3, 0, 0], sizes = [1, 16, 8], strides = [1, 1, 1]} : vector<4x16x8xf32> to vector<1x16x8xf32>
    %180 = vector.shape_cast %179 : vector<1x16x8xf32> to vector<16x8xf32>
    %181 = tpu.concatenate %174, %176, %178, %180 in 1 : vector<16x8xf32>, vector<16x8xf32>, vector<16x8xf32>, vector<16x8xf32> -> vector<16x32xf32>
    %182 = arith.truncf %181 : vector<16x32xf32> to vector<16x32xbf16>
    %cst_37 = arith.constant dense<0.000000e+00> : vector<16x32xf32>
    %183 = tpu.matmul %182, %125, %cst_37 {dimension_numbers = #tpu.dot_dimension_numbers<[1], [0], [0], [1], [0, 0, 1, 1], [], []>} : vector<16x32xbf16>, vector<32x32xbf16>, vector<16x32xf32> -> vector<16x32xf32>
    %184 = vector.broadcast %126 : vector<1x32xf32> to vector<16x32xf32>
    %185 = arith.addf %183, %184 : vector<16x32xf32>
    %186 = arith.addf %93, %185 : vector<16x32xf32>
    %cst_38 = arith.constant dense<0.000000e+00> : vector<16xf32>
    %187 = vector.multi_reduction <add>, %186, %cst_38 [1] : vector<16x32xf32> to vector<16xf32>
    %188 = vector.shape_cast %187 : vector<16xf32> to vector<16x1xf32>
    %cst_39 = arith.constant 3.200000e+01 : f32
    %189 = vector.broadcast %cst_39 : f32 to vector<16x1xf32>
    %190 = arith.divf %188, %189 : vector<16x1xf32>
    %191 = vector.broadcast %190 : vector<16x1xf32> to vector<16x32xf32>
    %192 = arith.subf %186, %191 : vector<16x32xf32>
    %193 = arith.mulf %192, %192 : vector<16x32xf32>
    %cst_40 = arith.constant dense<0.000000e+00> : vector<16xf32>
    %194 = vector.multi_reduction <add>, %193, %cst_40 [1] : vector<16x32xf32> to vector<16xf32>
    %195 = vector.shape_cast %194 : vector<16xf32> to vector<16x1xf32>
    %cst_41 = arith.constant 3.200000e+01 : f32
    %196 = vector.broadcast %cst_41 : f32 to vector<16x1xf32>
    %197 = arith.divf %195, %196 : vector<16x1xf32>
    %198 = vector.broadcast %190 : vector<16x1xf32> to vector<16x32xf32>
    %199 = arith.subf %186, %198 : vector<16x32xf32>
    %cst_42 = arith.constant 9.99999997E-7 : f32
    %200 = vector.broadcast %cst_42 : f32 to vector<16x1xf32>
    %201 = arith.addf %197, %200 : vector<16x1xf32>
    %202 = math.rsqrt %201 : vector<16x1xf32>
    %203 = vector.broadcast %202 : vector<16x1xf32> to vector<16x32xf32>
    %204 = arith.mulf %199, %203 : vector<16x32xf32>
    %205 = arith.truncf %204 : vector<16x32xf32> to vector<16x32xbf16>
    %c0_43 = arith.constant 0 : index
    %c640 = arith.constant 640 : index
    %206 = vector.load %arg1[%c0_43, %c640] : memref<64x896xbf16, #tpu.memory_space<vmem>>, vector<32x64xbf16>
    %cst_44 = arith.constant dense<0.000000e+00> : vector<16x64xf32>
    %207 = tpu.matmul %205, %206, %cst_44 {dimension_numbers = #tpu.dot_dimension_numbers<[1], [0], [0], [1], [0, 0, 1, 1], [], []>} : vector<16x32xbf16>, vector<32x64xbf16>, vector<16x64xf32> -> vector<16x64xf32>
    %c5 = arith.constant 5 : index
    %c0_45 = arith.constant 0 : index
    %208 = vector.load %arg2[%c5, %c0_45] : memref<40x128xf32, #tpu.memory_space<vmem>>, vector<1x64xf32>
    %209 = vector.broadcast %208 : vector<1x64xf32> to vector<16x64xf32>
    %210 = arith.addf %207, %209 : vector<16x64xf32>
    %cst_46 = arith.constant 0.000000e+00 : f32
    %211 = vector.broadcast %cst_46 : f32 to vector<16x64xf32>
    %212 = arith.maximumf %210, %211 : vector<16x64xf32>
    %213 = arith.truncf %212 : vector<16x64xf32> to vector<16x64xbf16>
    %c0_47 = arith.constant 0 : index
    %c768 = arith.constant 768 : index
    %214 = vector.load %arg1[%c0_47, %c768] : memref<64x896xbf16, #tpu.memory_space<vmem>>, vector<64x32xbf16>
    %cst_48 = arith.constant dense<0.000000e+00> : vector<16x32xf32>
    %215 = tpu.matmul %213, %214, %cst_48 {dimension_numbers = #tpu.dot_dimension_numbers<[1], [0], [0], [1], [0, 0, 1, 1], [], []>} : vector<16x64xbf16>, vector<64x32xbf16>, vector<16x32xf32> -> vector<16x32xf32>
    %c6 = arith.constant 6 : index
    %c0_49 = arith.constant 0 : index
    %216 = vector.load %arg2[%c6, %c0_49] : memref<40x128xf32, #tpu.memory_space<vmem>>, vector<1x32xf32>
    %217 = vector.broadcast %216 : vector<1x32xf32> to vector<16x32xf32>
    %218 = arith.addf %215, %217 : vector<16x32xf32>
    %219 = arith.addf %186, %218 : vector<16x32xf32>
    %c0_50 = arith.constant 0 : index
    %c0_51 = arith.constant 0 : index
    %220 = vector.load %arg3[%c0_50, %c0_51] : memref<16x32xf32, #tpu.memory_space<vmem>>, vector<16x32xf32>
    tpu.vector_store %arg3[%c0_50, %c0_51], %219 {strides = array<i32>} : memref<16x32xf32, #tpu.memory_space<vmem>>, vector<16x32xf32>,
    return
  }
}

</mosaic_0001>

<bundles_post_ra>
// kernel: decoder_forward.1
= control target key start
LH: loop header
LB: loop body
LE: loop exit
PB: predicated region body
PF: predicated region fallthrough
CT: control target
= control target key end

     0   :  { %8 = vsyncpa [#allocation3], 0  ;;  %s2479_s0 = inlined_call_operand.vmem [shape: f32[32,32], index: 0, kind: input, shape index: {}]   ;;  %s2480_s1 = inlined_call_operand.hbm [shape: bf16[64,896], index: 1, kind: input, shape index: {}]   ;;  %s2481_s2 = inlined_call_operand.vmem [shape: f32[40,128], index: 2, kind: input, shape index: {}]   ;;  %s2482_s3 = inlined_call_operand.hbm [shape: f32[16,32], index: 3, kind: output, shape index: {}]  }
   0x1   :  { %9 = vsyncpa [#allocation4], 0  ;;  %s2097_s12 = smov [#allocation2]   ;;  %s2049_s16 = scalar_lea.hbm %s2480_s1, 3584 }
   0x2   :  { %s17_s13 = sshll.u32 %s2097_s12, 4  ;;  %p2050_p0 = scmp.ne.s32.totalorder %s2480_s1, %s2049_s16  ;;  %s18_s13 = int_to_ptr.vmem [resolvable:$true] %s17_s13 }
   0x3   :  { %p2053_p1 = scmp.lt.u32.totalorder %s2049_s16, %s2480_s1 }
   0x5   :  { %p2055_p2 = pnand %p2053_p1, %p2050_p0 }
   0x7   :  { %2058 = shalt.err (!%p2055_p2)
}
   0x8   :  { %s2059_s21 = scalar_lea.vmem %s18_s13, 3584  ;;  %p2064_p4 = scmp.lt.s32.totalorder %s18_s13, %s18_s13 }
   0x9   :  { %p2060_p3 = scmp.ne.s32.totalorder %s18_s13, %s2059_s21  ;;  %p2065_p5 = scmp.lt.s32.totalorder %s2059_s21, %s2059_s21 }
   0xb   :  { %p2066_p6 = por %p2065_p5, %p2064_p4 }
   0xd   :  { %p2067_p7 = pnand %p2066_p6, %p2060_p3 }
   0xf   :  { %2070 = shalt.err (!%p2067_p7)
}
  0x10   :  { %s2098_s22 = smov 448   ;;  %s2099_s23 = smov 28  }
  0x11   :  { %23 = dma.hbm_to_vmem [thread:$0]  %s2480_s1, 3584, %s18_s13, [#allocation3], %s2098_s22, %s2098_s22, %s2099_s23  }
  0x12   :  { %2093 = dma.done.wait [#allocation3], 3584  }
  0x13   :  { %2094 = vsyncadd [#allocation3], 4294963712  ;;  %vm39_vm0 = vcmask 261120   ;;  %v2147_v0 = vld [vmem:[%s2479_s0] sm:$0xff]  ;;  %v2152_v1 = vld [vmem:[%s2479_s0 + $0x8] sm:$0xff]  ;;  %v2100_v15 = vmov 0.0  }
  0x14   :  { %v40_v2 = vsel %vm39_vm0, %v2147_v0, 0.0  ;;  %v43_v3 = vsel %vm39_vm0, %v2152_v1, 0.0  ;;  %v1957_v14 = vld [vmem:[#allocation2] ss:$28 sps:$4 sm:$0xff]   ;;  %1756 = vmatprep.subr.bf16.mxu1 %v2100_v15  ;;  %vm2101_vm1 = vmmov 0   ;;  %1770 = vmatprep.subr.bf16.mxu0 %v2100_v15  ;;  %s2102_s4 = smov 112  }
  0x15   :  { %41 = vadd.xlane.f32.xlu0 %v40_v2  ;;  %1760 = vmatprep.mubr.msk.bf16.mxu1 %vm2101_vm1, %v2100_v15  ;;  %v1958_v16 = vld [vmem:[#allocation2 + $0x38] ss:$28 sps:$4 sm:$0xff]   ;;  %v1655_v28 = vld [vmem:[%s2481_s2] ss:$0 sm:$0xff]  ;;  %s2103_s5 = smov 120   ;;  %s2104_s6 = smov 104  }
  0x16   :  { %1757 = vmatpush3.bf16.msra.mxu1 %v1957_v14  ;;  %1772 = vmatprep.mubr.msk.bf16.mxu0 %vm2101_vm1, %v2100_v15  ;;  %s2105_s7 = smov 96   ;;  %vm148_vm2 = vcmask 64512   ;;  %v35_v47 = vld [vmem:[%s2481_s2 + $0x8] sm:$0xff]  ;;  %v36_v49 = vld [vmem:[%s2481_s2 + $0x10] sm:$0xff]  ;;  %vm343_vm3 = vcmask 130048   ;;  %s2106_s12 = smov 64  }
  0x17   :  { %1758 = vmatprep.subr.bf16.mxu1 %v2100_v15  ;;  %s2107_s13 = smov 8   ;;  %s2108_s14 = smov 16   ;;  %vm652_vm4 = vcmask 195584   ;;  %vm1589_vm5 = vcmask 523264  }
  0x18   :  { %s2109_s15 = smov 24  }
  0x19   :  { %44 = vadd.xlane.f32.xlu0 %v43_v3 }
  0x1a   :  { %1759 = vmatpush3.bf16.msra.mxu1 %v1958_v16 }
  0x1b   :  { %1764 = vmatprep.subr.bf16.mxu1 %v2100_v15 }
  0xa2   :  { %v42_v4 = vpop.xlane.xlu0 %41 }
  0xa3   :  { %v47_v5 = vmul.f32 0.03125, %v42_v4 }
  0xa5   :  { %v49_v6 = vsub.f32 %v2147_v0, %v47_v5 }
  0xa6   :  { %v45_v7 = vpop.xlane.xlu0 %44 }
  0xa7   :  { %v48_v8 = vmul.f32 0.03125, %v45_v7  ;;  %v51_v9 = vmul.f32 %v49_v6, %v49_v6 }
  0xa9   :  { %v50_v10 = vsub.f32 %v2152_v1, %v48_v8  ;;  %v53_v11 = vsel %vm39_vm0, %v51_v9, 0.0 }
  0xaa   :  { %54 = vadd.xlane.f32.xlu1 %v53_v11 }
  0xab   :  { %v52_v12 = vmul.f32 %v50_v10, %v50_v10 }
  0xad   :  { %v56_v13 = vsel %vm39_vm0, %v52_v12, 0.0 }
  0xae   :  { %57 = vadd.xlane.f32.xlu1 %v56_v13 }
 0x137   :  { %v55_v17 = vpop.xlane.xlu1 %54 }
 0x138   :  { %v59_v18 = vmul.f32 0.03125, %v55_v17 }
 0x13a   :  { %v61_v19 = vadd.f32 1e-06, %v59_v18 }
 0x13b   :  { %v58_v20 = vpop.xlane.xlu1 %57 }
 0x13c   :  { %v60_v21 = vmul.f32 0.03125, %v58_v20  ;;  %1973 = vrsqrt.f32 %v61_v19 }
 0x13e   :  { %v62_v22 = vadd.f32 1e-06, %v60_v21 }
 0x140   :  { %1975 = vrsqrt.f32 %v62_v22 }
 0x146   :  { %v1974_v23 = vpop.eup %1973 }
 0x147   :  { %v65_v25 = vmul.f32 %v1974_v23, %v49_v6 }
 0x14a   :  { %v1976_v24 = vpop.eup %1975 }
 0x14b   :  { %v66_v26 = vmul.f32 %v1976_v24, %v50_v10 }
 0x14d   :  { %v67_v27 = vpack.c.bf16 %v66_v26, %v65_v25 }
 0x14f   :  { %1761 = vmatmul.mubr.msk.bf16.vlgmr.msra.gmra.mrb[0].mxu1 %vm39_vm0, %v67_v27 }
 0x150   :  { %1766 = vmatprep.mubr.msk.bf16.mxu1 %vm2101_vm1, %v2100_v15 }
 0x222   :  { %v126_v29 = vpop.f32.mrb[0].mxu1 }
 0x223   :  { %v1762_v30 = vpop.f32.mrb[1].mxu1  ;;  %v127_v32 = vadd.f32 %v1655_v28, %v126_v29 }
 0x224   :  { %v129_v31 = vpop.f32.mrb[2].mxu1 }
 0x225   :  { %v130_v33 = vadd.f32 %v1655_v28, %v129_v31  ;;  %v1763_v34 = vpop.f32.mrb[3].mxu1 }
 0x227   :  { %v2176_v35 = vpack.c.bf16 %v130_v33, %v127_v32 }
 0x229   :  { %142 = vrot.lane.b32.xlu1 %v2176_v35, %s2102_s4  ;;  %140 = vrot.lane.b32.xlu0 %v2176_v35, %s2103_s5 }
 0x22d   :  { %144 = vrot.lane.b32.xlu1 %v2176_v35, %s2104_s6 }
 0x231   :  { %146 = vrot.lane.b32.xlu1 %v2176_v35, %s2105_s7 }
 0x29b   :  { %v2186_v36 = vpop.permute.xlu1 %142  ;;  %v2188_v37 = vpop.permute.xlu0 %140 }
 0x29c   :  { %245 = vrot.lane.b32.xlu1 %v2186_v36, %s2105_s7  ;;  %196 = vrot.lane.b32.xlu0 %v2188_v37, %s2105_s7 }
 0x29f   :  { %v2194_v38 = vpop.permute.xlu1 %144 }
 0x2a0   :  { %294 = vrot.lane.b32.xlu0 %v2194_v38, %s2105_s7 }
 0x2a3   :  { %v147_v39 = vpop.permute.xlu1 %146 }
 0x2a4   :  { %v153_v40 = vsel %vm148_vm2, %v147_v39, 0 }
 0x2a5   :  { %1765 = vmatpush3.bf16.xpose.msra.mxu1 %v153_v40 }
 0x2a6   :  { %1776 = vmatprep.subr.bf16.mxu1 %v2100_v15 }
 0x2ac   :  { %1767 = vmatmul.mubr.msk.bf16.vlgmr.msra.gmra.mrb[4].mxu1 %vm148_vm2, %v2176_v35 }
 0x2ad   :  { %1778 = vmatprep.mubr.msk.bf16.mxu1 %vm2101_vm1, %v2100_v15 }
 0x30e   :  { %v246_v41 = vpop.permute.xlu1 %245  ;;  %v197_v42 = vpop.permute.xlu0 %196 }
 0x30f   :  { %v251_v43 = vsel %vm148_vm2, %v246_v41, 0  ;;  %v202_v44 = vsel %vm148_vm2, %v197_v42, 0 }
 0x310   :  { %1771 = vmatpush3.bf16.xpose.msra.mxu0 %v202_v44  ;;  %1777 = vmatpush3.bf16.xpose.msra.mxu1 %v251_v43 }
 0x311   :  { %1782 = vmatprep.subr.bf16.mxu0 %v2100_v15  ;;  %1788 = vmatprep.subr.bf16.mxu1 %v2100_v15 }
 0x312   :  { %v295_v45 = vpop.permute.xlu0 %294 }
 0x313   :  { %v300_v46 = vsel %vm148_vm2, %v295_v45, 0 }
 0x317   :  { %1773 = vmatmul.mubr.msk.bf16.vlgmr.msra.gmra.mrb[0].mxu0 %vm148_vm2, %v2188_v37  ;;  %1779 = vmatmul.mubr.msk.bf16.vlgmr.msra.gmra.mrb[8].mxu1 %vm148_vm2, %v2186_v36 }
 0x318   :  { %1783 = vmatpush3.bf16.xpose.msra.mxu0 %v300_v46  ;;  %1784 = vmatprep.mubr.msk.bf16.mxu0 %vm2101_vm1, %v2100_v15 }
 0x319   :  { %1790 = vmatprep.mubr.msk.bf16.mxu1 %vm2101_vm1, %v2100_v15  ;;  %1794 = vmatprep.subr.bf16.mxu0 %v2100_v15 }
 0x31f   :  { %1785 = vmatmul.mubr.msk.bf16.vlgmr.msra.gmra.mrb[4].mxu0 %vm148_vm2, %v2194_v38 }
 0x320   :  { %1796 = vmatprep.mubr.msk.bf16.mxu0 %vm2101_vm1, %v2100_v15 }
 0x37f   :  { %v189_v48 = vpop.f32.mrb[4].mxu1 }
 0x380   :  { %v190_v50 = vadd.f32 %v189_v48, %v35_v47  ;;  %v1768_v51 = vpop.f32.mrb[5].mxu1 }
 0x381   :  { %v192_v52 = vpop.f32.mrb[6].mxu1 }
 0x382   :  { %v193_v53 = vadd.f32 %v192_v52, %v36_v49  ;;  %v1769_v54 = vpop.f32.mrb[7].mxu1  ;;  %v344_v55 = vsel %vm343_vm3, %v190_v50, -inf }
 0x383   :  { %345 = vmax.xlane.f32.xlu1 %v344_v55 }
 0x384   :  { %v347_v56 = vsel %vm343_vm3, %v193_v53, -inf }
 0x385   :  { %348 = vmax.xlane.f32.xlu0 %v347_v56 }
 0x3ea   :  { %v238_v57 = vpop.f32.mrb[0].mxu0  ;;  %v287_v58 = vpop.f32.mrb[8].mxu1 }
 0x3eb   :  { %v239_v59 = vadd.f32 %v238_v57, %v35_v47  ;;  %v288_v60 = vadd.f32 %v287_v58, %v35_v47  ;;  %v1774_v61 = vpop.f32.mrb[1].mxu0  ;;  %v1780_v62 = vpop.f32.mrb[9].mxu1 }
 0x3ec   :  { %v241_v63 = vpop.f32.mrb[2].mxu0  ;;  %v290_v2 = vpop.f32.mrb[10].mxu1 }
 0x3ed   :  { %v242_v3 = vadd.f32 %v241_v63, %v36_v49  ;;  %v1775_v4 = vpop.f32.mrb[3].mxu0  ;;  %v1781_v5 = vpop.f32.mrb[11].mxu1  ;;  %v350_v6 = vsel %vm343_vm3, %v239_v59, -inf  ;;  %v356_v7 = vsel %vm343_vm3, %v288_v60, -inf  ;;  %v291_v8 = vadd.f32 %v290_v2, %v36_v49 }
 0x3ee   :  { %351 = vmax.xlane.f32.xlu0 %v350_v6  ;;  %357 = vmax.xlane.f32.xlu1 %v356_v7 }
 0x3ef   :  { %v353_v9 = vsel %vm343_vm3, %v242_v3, -inf  ;;  %v359_v18 = vsel %vm343_vm3, %v291_v8, -inf }
 0x3f2   :  { %v336_v10 = vpop.f32.mrb[4].mxu0  ;;  %354 = vmax.xlane.f32.xlu0 %v353_v9 }
 0x3f3   :  { %v337_v11 = vadd.f32 %v336_v10, %v35_v47  ;;  %v1786_v12 = vpop.f32.mrb[5].mxu0 }
 0x3f4   :  { %v339_v13 = vpop.f32.mrb[6].mxu0 }
 0x3f5   :  { %v340_v14 = vadd.f32 %v339_v13, %v36_v49  ;;  %v1787_v16 = vpop.f32.mrb[7].mxu0  ;;  %v362_v17 = vsel %vm343_vm3, %v337_v11, -inf }
 0x3f6   :  { %363 = vmax.xlane.f32.xlu1 %v362_v17  ;;  %360 = vmax.xlane.f32.xlu0 %v359_v18 }
 0x3f7   :  { %v365_v19 = vsel %vm343_vm3, %v340_v14, -inf }
 0x3fa   :  { %366 = vmax.xlane.f32.xlu0 %v365_v19 }
 0x407   :  { %436 = vrot.lane.b32.xlu1 %v2176_v35, %s2106_s12 }
 0x410   :  { %v346_v20 = vpop.xlane.xlu1 %345 }
 0x411   :  { %v368_v23 = vsub.f32 %v190_v50, %v346_v20 }
 0x412   :  { %v349_v21 = vpop.xlane.xlu0 %348 }
 0x413   :  { %v369_v22 = vsub.f32 %v193_v53, %v349_v21  ;;  %v376_v25 = vmul.f32 1.442695, %v368_v23 }
 0x415   :  { %v378_v24 = vmul.f32 1.442695, %v369_v22 }
 0x417   :  { %1977 = vpow2.f32 %v378_v24 }
 0x418   :  { %1979 = vpow2.f32 %v376_v25 }
 0x421   :  { %v1978_v26 = vpop.eup %1977 }
 0x422   :  { %v395_v27 = vsel %vm343_vm3, %v1978_v26, 0.0  ;;  %v1980_v28 = vpop.eup %1979 }
 0x423   :  { %396 = vadd.xlane.f32.xlu0 %v395_v27  ;;  %v392_v29 = vsel %vm343_vm3, %v1980_v28, 0.0 }
 0x42b   :  { %393 = vadd.xlane.f32.xlu1 %v392_v29 }
 0x47b   :  { %v352_v30 = vpop.xlane.xlu0 %351  ;;  %v358_v31 = vpop.xlane.xlu1 %357 }
 0x47c   :  { %v370_v32 = vsub.f32 %v239_v59, %v352_v30  ;;  %v372_v33 = vsub.f32 %v288_v60, %v358_v31 }
 0x47e   :  { %v380_v34 = vmul.f32 1.442695, %v370_v32  ;;  %v384_v35 = vmul.f32 1.442695, %v372_v33 }
 0x47f   :  { %v355_v39 = vpop.xlane.xlu0 %354 }
 0x480   :  { %1981 = vpow2.f32 %v380_v34  ;;  %v371_v40 = vsub.f32 %v242_v3, %v355_v39 }
 0x481   :  { %1983 = vpow2.f32 %v384_v35  ;;  %v1959_v35 = vld [vmem:[#allocation2 + $0xc] ss:$28 sps:$4 sm:$0xff]  }
 0x482   :  { %v382_v41 = vmul.f32 1.442695, %v371_v40  ;;  %v1960_v40 = vld [vmem:[#allocation2 + $0x44] ss:$28 sps:$4 sm:$0xff]  }
 0x483   :  { %v364_v42 = vpop.xlane.xlu1 %363  ;;  %v361_v43 = vpop.xlane.xlu0 %360 }
 0x484   :  { %1985 = vpow2.f32 %v382_v41  ;;  %v374_v44 = vsub.f32 %v337_v11, %v364_v42  ;;  %v373_v45 = vsub.f32 %v291_v8, %v361_v43 }
 0x486   :  { %v388_v46 = vmul.f32 1.442695, %v374_v44  ;;  %v386_v47 = vmul.f32 1.442695, %v373_v45 }
 0x487   :  { %v437_v48 = vpop.permute.xlu1 %436  ;;  %v367_v49 = vpop.xlane.xlu0 %366 }
 0x488   :  { %1987 = vpow2.f32 %v388_v46  ;;  %v375_v50 = vsub.f32 %v340_v14, %v367_v49  ;;  %1789 = vmatpush3.bf16.msra.mxu1 %v437_v48 }
 0x489   :  { %1989 = vpow2.f32 %v386_v47  ;;  %1800 = vmatprep.subr.bf16.mxu1 %v2100_v15 }
 0x48a   :  { %v1982_v51 = vpop.eup %1981  ;;  %v390_v52 = vmul.f32 1.442695, %v375_v50 }
 0x48b   :  { %v398_v53 = vsel %vm343_vm3, %v1982_v51, 0.0  ;;  %v1984_v54 = vpop.eup %1983 }
 0x48c   :  { %1991 = vpow2.f32 %v390_v52  ;;  %399 = vadd.xlane.f32.xlu1 %v398_v53  ;;  %v404_v56 = vsel %vm343_vm3, %v1984_v54, 0.0 }
 0x48e   :  { %v1986_v55 = vpop.eup %1985 }
 0x48f   :  { %v401_v57 = vsel %vm343_vm3, %v1986_v55, 0.0 }
 0x490   :  { %405 = vadd.xlane.f32.xlu1 %v404_v56  ;;  %402 = vadd.xlane.f32.xlu0 %v401_v57 }
 0x492   :  { %v1988_v58 = vpop.eup %1987 }
 0x493   :  { %v1990_v59 = vpop.eup %1989  ;;  %v410_v60 = vsel %vm343_vm3, %v1988_v58, 0.0 }
 0x494   :  { %411 = vadd.xlane.f32.xlu1 %v410_v60  ;;  %v407_v61 = vsel %vm343_vm3, %v1990_v59, 0.0 }
 0x495   :  { %408 = vadd.xlane.f32.xlu0 %v407_v61 }
 0x496   :  { %v1992_v62 = vpop.eup %1991 }
 0x497   :  { %v413_v63 = vsel %vm343_vm3, %v1992_v62, 0.0 }
 0x499   :  { %414 = vadd.xlane.f32.xlu0 %v413_v63 }
 0x4a5   :  { %530 = vrot.lane.b32.xlu1 %v2186_v36, %s2106_s12 }
 0x4a9   :  { %577 = vrot.lane.b32.xlu1 %v2194_v38, %s2106_s12 }
 0x4af   :  { %483 = vrot.lane.b32.xlu0 %v2188_v37, %s2106_s12 }
 0x4b0   :  { %v397_v2 = vpop.xlane.xlu0 %396 }
 0x4b1   :  { %1993 = vrcp.f32 %v397_v2 }
 0x4b8   :  { %v394_v3 = vpop.xlane.xlu1 %393 }
 0x4b9   :  { %1995 = vrcp.f32 %v394_v3 }
 0x4bb   :  { %v1994_v4 = vpop.eup %1993 }
 0x4bc   :  { %v425_v6 = vmul.f32 %v1994_v4, %v1978_v26 }
 0x4c3   :  { %v1996_v5 = vpop.eup %1995 }
 0x4c4   :  { %v424_v7 = vmul.f32 %v1996_v5, %v1980_v28 }
 0x4c6   :  { %v432_v8 = vpack.c.bf16 %v425_v6, %v424_v7 }
 0x4c8   :  { %1791 = vmatmul.mubr.msk.bf16.vlgmr.msra.gmra.mrb[12].mxu1 %vm343_vm3, %v432_v8 }
 0x4c9   :  { %1802 = vmatprep.mubr.msk.bf16.mxu1 %vm2101_vm1, %v2100_v15 }
 0x519   :  { %v400_v36 = vpop.xlane.xlu1 %399 }
 0x51a   :  { %1997 = vrcp.f32 %v400_v36  ;;  %v1667_v36 = vld [vmem:[%s2481_s2 + $0x3] ss:$0 sm:$0xff] }
 0x51d   :  { %v406_v38 = vpop.xlane.xlu1 %405  ;;  %v403_v9 = vpop.xlane.xlu0 %402 }
 0x51e   :  { %1999 = vrcp.f32 %v403_v9 }
 0x51f   :  { %2001 = vrcp.f32 %v406_v38 }
 0x521   :  { %v412_v37 = vpop.xlane.xlu1 %411 }
 0x522   :  { %v409_v10 = vpop.xlane.xlu0 %408 }
 0x523   :  { %2003 = vrcp.f32 %v409_v10 }
 0x524   :  { %2005 = vrcp.f32 %v412_v37  ;;  %v1998_v13 = vpop.eup %1997 }
 0x525   :  { %v531_v11 = vpop.permute.xlu1 %530  ;;  %v426_v16 = vmul.f32 %v1998_v13, %v1982_v51 }
 0x526   :  { %v415_v12 = vpop.xlane.xlu0 %414  ;;  %1801 = vmatpush3.bf16.msra.mxu1 %v531_v11 }
 0x527   :  { %2007 = vrcp.f32 %v415_v12  ;;  %1812 = vmatprep.subr.bf16.mxu1 %v2100_v15 }
 0x528   :  { %v2000_v14 = vpop.eup %1999 }
 0x529   :  { %v427_v17 = vmul.f32 %v2000_v14, %v1986_v55  ;;  %v2002_v19 = vpop.eup %2001  ;;  %v578_v24 = vpop.permute.xlu1 %577 }
 0x52a   :  { %v484_v18 = vpop.permute.xlu0 %483  ;;  %v428_v22 = vmul.f32 %v2002_v19, %v1984_v54 }
 0x52b   :  { %1795 = vmatpush3.bf16.msra.mxu0 %v484_v18  ;;  %v433_v20 = vpack.c.bf16 %v427_v17, %v426_v16 }
 0x52c   :  { %1806 = vmatprep.subr.bf16.mxu0 %v2100_v15 }
 0x52d   :  { %v2004_v21 = vpop.eup %2003 }
 0x52e   :  { %v429_v23 = vmul.f32 %v2004_v21, %v1990_v59  ;;  %1797 = vmatmul.mubr.msk.bf16.vlgmr.msra.gmra.mrb[8].mxu0 %vm343_vm3, %v433_v20  ;;  %v2006_v25 = vpop.eup %2005 }
 0x52f   :  { %1807 = vmatpush3.bf16.msra.mxu0 %v578_v24  ;;  %1808 = vmatprep.mubr.msk.bf16.mxu0 %vm2101_vm1, %v2100_v15  ;;  %v430_v28 = vmul.f32 %v2006_v25, %v1988_v58 }
 0x530   :  { %v434_v26 = vpack.c.bf16 %v429_v23, %v428_v22  ;;  %1820 = vmatprep.subr.bf16.mxu0 %v2100_v15 }
 0x531   :  { %v2008_v27 = vpop.eup %2007 }
 0x532   :  { %v431_v29 = vmul.f32 %v2008_v27, %v1992_v62  ;;  %1803 = vmatmul.mubr.msk.bf16.vlgmr.msra.gmra.mrb[16].mxu1 %vm343_vm3, %v434_v26  ;;  %v1961_v26 = vld [vmem:[#allocation2 + $0x8] ss:$28 sps:$4 sm:$0xff]   ;;  %v1962_v27 = vld [vmem:[#allocation2 + $0x40] ss:$28 sps:$4 sm:$0xff]  }
 0x533   :  { %1816 = vmatprep.mubr.msk.bf16.mxu1 %vm2101_vm1, %v2100_v15  ;;  %1813 = vmatpush3.bf16.msra.mxu1 %v1959_v35 }
 0x534   :  { %v435_v30 = vpack.c.bf16 %v431_v29, %v430_v28  ;;  %1814 = vmatprep.subr.bf16.mxu1 %v2100_v15  ;;  %v32_v28 = vld [vmem:[%s2479_s0 + $0x10] sm:$0xff]  ;;  %v33_v29 = vld [vmem:[%s2479_s0 + $0x18] sm:$0xff] }
 0x536   :  { %1809 = vmatmul.mubr.msk.bf16.vlgmr.msra.gmra.mrb[12].mxu0 %vm343_vm3, %v435_v30  ;;  %v34_v30 = vpack.c.bf16 %v33_v29, %v32_v28 }
 0x537   :  { %1824 = vmatprep.mubr.msk.bf16.mxu0 %vm2101_vm1, %v2100_v15  ;;  %1815 = vmatpush3.bf16.msra.mxu1 %v1960_v40 }
 0x538   :  { %1828 = vmatprep.subr.bf16.mxu1 %v2100_v15 }
 0x59b   :  { %v476_v31 = vpop.f32.mrb[12].mxu1 }
 0x59c   :  { %v1792_v32 = vpop.f32.mrb[13].mxu1 }
 0x59d   :  { %v479_v33 = vpop.f32.mrb[14].mxu1  ;;  %v1964_v32 = vld [vmem:[#allocation2 + $0x3c] ss:$28 sps:$4 sm:$0xff]  }
 0x59e   :  { %v1793_v34 = vpop.f32.mrb[15].mxu1 }
 0x601   :  { %v523_v39 = vpop.f32.mrb[8].mxu0 }
 0x602   :  { %v1798_v41 = vpop.f32.mrb[9].mxu0 }
 0x603   :  { %v526_v42 = vpop.f32.mrb[10].mxu0 }
 0x604   :  { %v1927_v43 = vpack.i.bf16 %v526_v42, %v523_v39  ;;  %v1799_v44 = vpop.f32.mrb[11].mxu0 }
 0x605   :  { %v570_v45 = vpop.f32.mrb[16].mxu1 }
 0x606   :  { %1928 = vrot.lane.b32.xlu1 %v1927_v43, %s2107_s13  ;;  %v1804_v46 = vpop.f32.mrb[17].mxu1 }
 0x607   :  { %v573_v47 = vpop.f32.mrb[18].mxu1 }
 0x608   :  { %v1932_v48 = vpack.i.bf16 %v573_v47, %v570_v45  ;;  %v1805_v49 = vpop.f32.mrb[19].mxu1  ;;  %v1675_v47 = vld [vmem:[%s2481_s2 + $0x2] ss:$0 sm:$0xff] }
 0x609   :  { %v617_v50 = vpop.f32.mrb[12].mxu0 }
 0x60a   :  { %v1810_v51 = vpop.f32.mrb[13].mxu0  ;;  %1933 = vrot.lane.b32.xlu0 %v1932_v48, %s2108_s14 }
 0x60b   :  { %v620_v52 = vpop.f32.mrb[14].mxu0 }
 0x60c   :  { %v1937_v53 = vpack.i.bf16 %v620_v52, %v617_v50  ;;  %v1811_v54 = vpop.f32.mrb[15].mxu0 }
 0x60e   :  { %1938 = vrot.lane.b32.xlu1 %v1937_v53, %s2109_s15 }
 0x678   :  { %v1929_v55 = vpop.permute.xlu1 %1928 }
 0x679   :  { %v1931_v57 = vunpack.i.h.bf16 %v1929_v55  ;;  %v1930_v58 = vunpack.i.l.bf16 %v1929_v55 }
 0x67b   :  { %v648_v62 = vsel %vm148_vm2, %v476_v31, %v1930_v58  ;;  %v649_v63 = vsel %vm148_vm2, %v479_v33, %v1931_v57  ;;  %v1963_v31 = vld [vmem:[#allocation2 + $0x4] ss:$28 sps:$4 sm:$0xff]  }
 0x67c   :  { %v1934_v56 = vpop.permute.xlu0 %1933  ;;  %1821 = vmatpush3.bf16.msra.mxu0 %v1963_v31  ;;  %v1671_v58 = vld [vmem:[%s2481_s2 + $0x1] ss:$0 sm:$0xff] }
 0x67d   :  { %v1936_v59 = vunpack.i.h.bf16 %v1934_v56  ;;  %v1935_v60 = vunpack.i.l.bf16 %v1934_v56  ;;  %1822 = vmatprep.subr.bf16.mxu0 %v2100_v15 }
 0x67f   :  { %v651_v4 = vsel %vm343_vm3, %v649_v63, %v1936_v59  ;;  %v650_v5 = vsel %vm343_vm3, %v648_v62, %v1935_v60 }
 0x680   :  { %v1939_v61 = vpop.permute.xlu1 %1938  ;;  %1823 = vmatpush3.bf16.msra.mxu0 %v1964_v32 }
 0x681   :  { %v1941_v2 = vunpack.i.h.bf16 %v1939_v61  ;;  %v1940_v3 = vunpack.i.l.bf16 %v1939_v61  ;;  %1836 = vmatprep.subr.bf16.mxu0 %v2100_v15 }
 0x683   :  { %v653_v6 = vsel %vm652_vm4, %v650_v5, %v1940_v3  ;;  %v654_v7 = vsel %vm652_vm4, %v651_v4, %v1941_v2 }
 0x684   :  { %v655_v8 = vpack.c.bf16 %v654_v7, %v653_v6 }
 0x686   :  { %1817 = vmatmul.mubr.msk.bf16.vlgmr.msra.gmra.mrb[20].mxu1 %vm39_vm0, %v655_v8 }
 0x687   :  { %1832 = vmatprep.mubr.msk.bf16.mxu1 %vm2101_vm1, %v2100_v15  ;;  %1829 = vmatpush3.bf16.msra.mxu1 %v1961_v26 }
 0x688   :  { %1830 = vmatprep.subr.bf16.mxu1 %v2100_v15 }
 0x68b   :  { %1831 = vmatpush3.bf16.msra.mxu1 %v1962_v27 }
 0x68c   :  { %1842 = vmatprep.subr.bf16.mxu1 %v2100_v15 }
 0x68e   :  { %1833 = vmatmul.mubr.msk.bf16.vlgmr.msra.gmra.mrb[24].mxu1 %vm39_vm0, %v34_v30 }
 0x68f   :  { %1844 = vmatprep.mubr.msk.bf16.mxu1 %vm2101_vm1, %v2100_v15 }
 0x759   :  { %v709_v38 = vpop.f32.mrb[20].mxu1 }
 0x75a   :  { %v710_v9 = vadd.f32 %v1667_v36, %v709_v38  ;;  %v1818_v37 = vpop.f32.mrb[21].mxu1 }
 0x75b   :  { %v712_v10 = vpop.f32.mrb[22].mxu1 }
 0x75c   :  { %v2286_v11 = vadd.f32 %v710_v9, %v2147_v0  ;;  %v713_v12 = vadd.f32 %v1667_v36, %v712_v10  ;;  %v1819_v13 = vpop.f32.mrb[23].mxu1  ;;  %v37_v9 = vld [vmem:[%s2481_s2 + $0x18] sm:$0xff]  ;;  %v38_v10 = vld [vmem:[%s2481_s2 + $0x20] sm:$0xff] }
 0x75e   :  { %v2289_v14 = vadd.f32 %v713_v12, %v2152_v1  ;;  %v718_v16 = vsel %vm39_vm0, %v2286_v11, 0.0 }
 0x75f   :  { %719 = vadd.xlane.f32.xlu0 %v718_v16 }
 0x760   :  { %v721_v17 = vsel %vm39_vm0, %v2289_v14, 0.0 }
 0x761   :  { %722 = vadd.xlane.f32.xlu1 %v721_v17  ;;  %v868_v48 = vpop.f32.mrb[24].mxu1 }
 0x762   :  { %v869_v49 = vadd.f32 %v1675_v47, %v868_v48  ;;  %v1834_v50 = vpop.f32.mrb[25].mxu1 }
 0x763   :  { %v871_v51 = vpop.f32.mrb[26].mxu1 }
 0x764   :  { %v872_v52 = vadd.f32 %v1675_v47, %v871_v51  ;;  %v1835_v53 = vpop.f32.mrb[27].mxu1 }
 0x766   :  { %v2318_v54 = vpack.c.bf16 %v872_v52, %v869_v49 }
 0x768   :  { %v900_v55 = vsel %vm148_vm2, %v2318_v54, 0 }
 0x772   :  { %892 = vrot.lane.b32.xlu1 %v2318_v54, %s2102_s4 }
 0x7ec   :  { %v720_v18 = vpop.xlane.xlu0 %719 }
 0x7ed   :  { %v724_v19 = vmul.f32 0.03125, %v720_v18 }
 0x7ee   :  { %v723_v20 = vpop.xlane.xlu1 %722 }
 0x7ef   :  { %v726_v21 = vsub.f32 %v2286_v11, %v724_v19  ;;  %v725_v0 = vmul.f32 0.03125, %v723_v20 }
 0x7f1   :  { %v727_v22 = vsub.f32 %v2289_v14, %v725_v0  ;;  %v728_v23 = vmul.f32 %v726_v21, %v726_v21 }
 0x7f2   :  { %v2335_v3 = vpop.permute.xlu1 %892 }
 0x7f3   :  { %v730_v1 = vsel %vm39_vm0, %v728_v23, 0.0  ;;  %v729_v24 = vmul.f32 %v727_v22, %v727_v22  ;;  %v994_v5 = vsel %vm148_vm2, %v2335_v3, 0 }
 0x7f4   :  { %731 = vadd.xlane.f32.xlu0 %v730_v1 }
 0x7f5   :  { %v733_v25 = vsel %vm39_vm0, %v729_v24, 0.0 }
 0x7f8   :  { %734 = vadd.xlane.f32.xlu0 %v733_v25 }
 0x80e   :  { %890 = vrot.lane.b32.xlu0 %v2318_v54, %s2103_s5 }
 0x881   :  { %v732_v33 = vpop.xlane.xlu0 %731 }
 0x882   :  { %v736_v34 = vmul.f32 0.03125, %v732_v33 }
 0x884   :  { %v738_v35 = vadd.f32 1e-06, %v736_v34 }
 0x885   :  { %v735_v39 = vpop.xlane.xlu0 %734 }
 0x886   :  { %v737_v40 = vmul.f32 0.03125, %v735_v39  ;;  %2009 = vrsqrt.f32 %v738_v35 }
 0x888   :  { %v739_v41 = vadd.f32 1e-06, %v737_v40 }
 0x889   :  { %v2327_v56 = vpop.permute.xlu0 %890 }
 0x88a   :  { %2011 = vrsqrt.f32 %v739_v41  ;;  %v947_v57 = vsel %vm148_vm2, %v2327_v56, 0 }
 0x88b   :  { %1843 = vmatpush3.bf16.xpose.msra.mxu1 %v947_v57 }
 0x88c   :  { %1854 = vmatprep.subr.bf16.mxu1 %v2100_v15 }
 0x890   :  { %v2010_v42 = vpop.eup %2009 }
 0x891   :  { %v742_v44 = vmul.f32 %v2010_v42, %v726_v21 }
 0x894   :  { %v2012_v43 = vpop.eup %2011 }
 0x895   :  { %v743_v45 = vmul.f32 %v2012_v43, %v727_v22 }
 0x897   :  { %v744_v46 = vpack.c.bf16 %v743_v45, %v742_v44 }
 0x899   :  { %1825 = vmatmul.mubr.msk.bf16.vlgmr.msra.gmra.mrb[16].mxu0 %vm39_vm0, %v744_v46 }
 0x89a   :  { %1838 = vmatprep.mubr.msk.bf16.mxu0 %vm2101_vm1, %v2100_v15  ;;  %1837 = vmatpush3.bf16.xpose.msra.mxu0 %v900_v55 }
 0x89b   :  { %1848 = vmatprep.subr.bf16.mxu0 %v2100_v15 }
 0x96c   :  { %v803_v59 = vpop.f32.mrb[16].mxu0 }
 0x96d   :  { %v1826_v60 = vpop.f32.mrb[17].mxu0  ;;  %v804_v62 = vadd.f32 %v1671_v58, %v803_v59 }
 0x96e   :  { %v806_v61 = vpop.f32.mrb[18].mxu0 }
 0x96f   :  { %v807_v63 = vadd.f32 %v1671_v58, %v806_v61  ;;  %v1827_v2 = vpop.f32.mrb[19].mxu0 }
 0x971   :  { %v880_v4 = vpack.c.bf16 %v807_v63, %v804_v62 }
 0x973   :  { %882 = vrot.lane.b32.xlu1 %v880_v4, %s2103_s5  ;;  %884 = vrot.lane.b32.xlu0 %v880_v4, %s2102_s4 }
 0x974   :  { %1839 = vmatmul.mubr.msk.bf16.vlgmr.msra.gmra.mrb[20].mxu0 %vm148_vm2, %v880_v4 }
 0x975   :  { %1849 = vmatpush3.bf16.xpose.msra.mxu0 %v994_v5  ;;  %1850 = vmatprep.mubr.msk.bf16.mxu0 %vm2101_vm1, %v2100_v15 }
 0x976   :  { %1860 = vmatprep.subr.bf16.mxu0 %v2100_v15 }
 0x977   :  { %894 = vrot.lane.b32.xlu1 %v2318_v54, %s2104_s6 }
 0x97b   :  { %886 = vrot.lane.b32.xlu1 %v880_v4, %s2104_s6 }
 0x9e5   :  { %v883_v6 = vpop.permute.xlu1 %882  ;;  %v885_v7 = vpop.permute.xlu0 %884 }
 0x9e6   :  { %1845 = vmatmul.mubr.msk.bf16.vlgmr.msra.gmra.mrb[28].mxu1 %vm148_vm2, %v883_v6  ;;  %1851 = vmatmul.mubr.msk.bf16.vlgmr.msra.gmra.mrb[24].mxu0 %vm148_vm2, %v885_v7 }
 0x9e7   :  { %1856 = vmatprep.mubr.msk.bf16.mxu1 %vm2101_vm1, %v2100_v15  ;;  %1862 = vmatprep.mubr.msk.bf16.mxu0 %vm2101_vm1, %v2100_v15 }
 0x9e9   :  { %v2354_v8 = vpop.permute.xlu1 %894 }
 0x9ea   :  { %v1041_v36 = vsel %vm148_vm2, %v2354_v8, 0 }
 0x9eb   :  { %1855 = vmatpush3.bf16.xpose.msra.mxu1 %v1041_v36 }
 0x9ec   :  { %1866 = vmatprep.subr.bf16.mxu1 %v2100_v15 }
 0x9ed   :  { %v887_v38 = vpop.permute.xlu1 %886 }
 0x9f2   :  { %1857 = vmatmul.mubr.msk.bf16.vlgmr.msra.gmra.mrb[32].mxu1 %vm148_vm2, %v887_v38 }
 0x9f3   :  { %1868 = vmatprep.mubr.msk.bf16.mxu1 %vm2101_vm1, %v2100_v15 }
 0xa47   :  { %v936_v37 = vpop.f32.mrb[20].mxu0 }
 0xa48   :  { %v937_v12 = vadd.f32 %v936_v37, %v37_v9  ;;  %v1840_v13 = vpop.f32.mrb[21].mxu0 }
 0xa49   :  { %v939_v16 = vpop.f32.mrb[22].mxu0 }
 0xa4a   :  { %v940_v17 = vadd.f32 %v939_v16, %v38_v10  ;;  %v1841_v18 = vpop.f32.mrb[23].mxu0  ;;  %v1084_v19 = vsel %vm343_vm3, %v937_v12, -inf }
 0xa4b   :  { %1085 = vmax.xlane.f32.xlu0 %v1084_v19 }
 0xa4c   :  { %v1087_v20 = vsel %vm343_vm3, %v940_v17, -inf }
 0xa4d   :  { %1088 = vmax.xlane.f32.xlu1 %v1087_v20 }
 0xab9   :  { %v983_v21 = vpop.f32.mrb[28].mxu1  ;;  %v1030_v0 = vpop.f32.mrb[24].mxu0 }
 0xaba   :  { %v984_v22 = vadd.f32 %v983_v21, %v37_v9  ;;  %v1846_v23 = vpop.f32.mrb[29].mxu1  ;;  %v1852_v1 = vpop.f32.mrb[25].mxu0  ;;  %v1031_v32 = vadd.f32 %v1030_v0, %v37_v9 }
 0xabb   :  { %v986_v24 = vpop.f32.mrb[30].mxu1  ;;  %v1033_v25 = vpop.f32.mrb[26].mxu0 }
 0xabc   :  { %v987_v26 = vadd.f32 %v986_v24, %v38_v10  ;;  %v1034_v27 = vadd.f32 %v1033_v25, %v38_v10  ;;  %v1847_v28 = vpop.f32.mrb[31].mxu1  ;;  %v1853_v29 = vpop.f32.mrb[27].mxu0  ;;  %v1090_v30 = vsel %vm343_vm3, %v984_v22, -inf  ;;  %v1096_v34 = vsel %vm343_vm3, %v1031_v32, -inf }
 0xabd   :  { %1091 = vmax.xlane.f32.xlu0 %v1090_v30 }
 0xabe   :  { %v1099_v31 = vsel %vm343_vm3, %v1034_v27, -inf  ;;  %v1093_v33 = vsel %vm343_vm3, %v987_v26, -inf }
 0xabf   :  { %1100 = vmax.xlane.f32.xlu1 %v1099_v31 }
 0xac1   :  { %1094 = vmax.xlane.f32.xlu0 %v1093_v33 }
 0xac5   :  { %1097 = vmax.xlane.f32.xlu0 %v1096_v34  ;;  %v1077_v35 = vpop.f32.mrb[32].mxu1 }
 0xac6   :  { %v1078_v39 = vadd.f32 %v1077_v35, %v37_v9  ;;  %v1858_v40 = vpop.f32.mrb[33].mxu1 }
 0xac7   :  { %v1080_v41 = vpop.f32.mrb[34].mxu1 }
 0xac8   :  { %v1081_v42 = vadd.f32 %v1080_v41, %v38_v10  ;;  %v1859_v43 = vpop.f32.mrb[35].mxu1  ;;  %v1102_v44 = vsel %vm343_vm3, %v1078_v39, -inf }
 0xac9   :  { %1103 = vmax.xlane.f32.xlu0 %v1102_v44 }
 0xaca   :  { %v1105_v45 = vsel %vm343_vm3, %v1081_v42, -inf }
 0xacb   :  { %1106 = vmax.xlane.f32.xlu1 %v1105_v45 }
 0xad8   :  { %v1086_v46 = vpop.xlane.xlu0 %1085 }
 0xad9   :  { %v1108_v47 = vsub.f32 %v937_v12, %v1086_v46 }
 0xada   :  { %v1089_v48 = vpop.xlane.xlu1 %1088 }
 0xadb   :  { %v1116_v49 = vmul.f32 1.442695, %v1108_v47  ;;  %v1109_v50 = vsub.f32 %v940_v17, %v1089_v48 }
 0xadd   :  { %2013 = vpow2.f32 %v1116_v49  ;;  %v1118_v51 = vmul.f32 1.442695, %v1109_v50 }
 0xadf   :  { %2015 = vpow2.f32 %v1118_v51 }
 0xae7   :  { %v2376_v52 = vpop.eup %2013 }
 0xae8   :  { %v1132_v53 = vsel %vm343_vm3, %v2376_v52, 0.0 }
 0xae9   :  { %v2380_v55 = vpop.eup %2015  ;;  %1133 = vadd.xlane.f32.xlu0 %v1132_v53 }
 0xaea   :  { %v1135_v57 = vsel %vm343_vm3, %v2380_v55, 0.0 }
 0xaeb   :  { %1136 = vadd.xlane.f32.xlu1 %v1135_v57 }
 0xb4a   :  { %v1092_v58 = vpop.xlane.xlu0 %1091 }
 0xb4b   :  { %v1110_v59 = vsub.f32 %v984_v22, %v1092_v58 }
 0xb4c   :  { %v1101_v60 = vpop.xlane.xlu1 %1100 }
 0xb4d   :  { %v1120_v61 = vmul.f32 1.442695, %v1110_v59  ;;  %v1113_v62 = vsub.f32 %v1034_v27, %v1101_v60 }
 0xb4e   :  { %v1095_v63 = vpop.xlane.xlu0 %1094 }
 0xb4f   :  { %2017 = vpow2.f32 %v1120_v61  ;;  %v1111_v2 = vsub.f32 %v987_v26, %v1095_v63  ;;  %v1126_v4 = vmul.f32 1.442695, %v1113_v62 }
 0xb51   :  { %v1122_v5 = vmul.f32 1.442695, %v1111_v2 }
 0xb52   :  { %v1098_v6 = vpop.xlane.xlu0 %1097 }
 0xb53   :  { %2019 = vpow2.f32 %v1122_v5  ;;  %v1112_v7 = vsub.f32 %v1031_v32, %v1098_v6 }
 0xb54   :  { %2021 = vpow2.f32 %v1126_v4  ;;  %v1965_v4 = vld [vmem:[#allocation2 + $0x10] ss:$28 sps:$4 sm:$0xff]  }
 0xb55   :  { %v1124_v36 = vmul.f32 1.442695, %v1112_v7 }
 0xb56   :  { %v1104_v38 = vpop.xlane.xlu0 %1103 }
 0xb57   :  { %2023 = vpow2.f32 %v1124_v36  ;;  %v1114_v9 = vsub.f32 %v1078_v39, %v1104_v38 }
 0xb58   :  { %v1107_v22 = vpop.xlane.xlu1 %1106 }
 0xb59   :  { %v2018_v37 = vpop.eup %2017  ;;  %v1128_v10 = vmul.f32 1.442695, %v1114_v9  ;;  %v1115_v23 = vsub.f32 %v1081_v42, %v1107_v22 }
 0xb5a   :  { %v1138_v12 = vsel %vm343_vm3, %v2018_v37, 0.0 }
 0xb5b   :  { %2025 = vpow2.f32 %v1128_v10  ;;  %1139 = vadd.xlane.f32.xlu0 %v1138_v12  ;;  %v1130_v1 = vmul.f32 1.442695, %v1115_v23  ;;  %v1966_v12 = vld [vmem:[#allocation2 + $0x48] ss:$28 sps:$4 sm:$0xff]  }
 0xb5d   :  { %v2020_v13 = vpop.eup %2019  ;;  %2027 = vpow2.f32 %v1130_v1 }
 0xb5e   :  { %v1141_v16 = vsel %vm343_vm3, %v2020_v13, 0.0  ;;  %v2022_v17 = vpop.eup %2021 }
 0xb5f   :  { %1142 = vadd.xlane.f32.xlu1 %v1141_v16  ;;  %v1147_v20 = vsel %vm343_vm3, %v2022_v17, 0.0 }
 0xb61   :  { %v2024_v18 = vpop.eup %2023 }
 0xb62   :  { %v1144_v19 = vsel %vm343_vm3, %v2024_v18, 0.0 }
 0xb63   :  { %1145 = vadd.xlane.f32.xlu0 %v1144_v19  ;;  %1148 = vadd.xlane.f32.xlu1 %v1147_v20 }
 0xb65   :  { %v2388_v21 = vpop.eup %2025 }
 0xb66   :  { %v1150_v0 = vsel %vm343_vm3, %v2388_v21, 0.0 }
 0xb67   :  { %1151 = vadd.xlane.f32.xlu0 %v1150_v0  ;;  %v2028_v24 = vpop.eup %2027 }
 0xb68   :  { %v1153_v25 = vsel %vm343_vm3, %v2028_v24, 0.0 }
 0xb74   :  { %1223 = vrot.lane.b32.xlu1 %v2327_v56, %s2105_s7 }
 0xb76   :  { %v1134_v26 = vpop.xlane.xlu0 %1133 }
 0xb78   :  { %1270 = vrot.lane.b32.xlu1 %v2335_v3, %s2105_s7  ;;  %v1137_v27 = vpop.xlane.xlu1 %1136 }
 0xb79   :  { %2029 = vrcp.f32 %v1137_v27 }
 0xb7a   :  { %2031 = vrcp.f32 %v1134_v26 }
 0xb7d   :  { %1176 = vrot.lane.b32.xlu0 %v2318_v54, %s2105_s7 }
 0xb83   :  { %v2030_v29 = vpop.eup %2029 }
 0xb84   :  { %v2032_v30 = vpop.eup %2031 }
 0xb85   :  { %v1164_v35 = vmul.f32 %v2032_v30, %v2376_v52 }
 0xb9c   :  { %1154 = vadd.xlane.f32.xlu1 %v1153_v25 }
 0xbad   :  { %1317 = vrot.lane.b32.xlu1 %v2354_v8, %s2105_s7  ;;  %v1165_v8 = vmul.f32 %v2030_v29, %v2380_v55  ;;  %s2110_s7 = smov [#allocation5]  }
 0xbae   :  { %s1643_s8 = sshll.u32 %s2110_s7, 4  ;;  %s1644_s8 = int_to_ptr.vmem [resolvable:$true] %s1643_s8 }
 0xbaf   :  { %v1172_v42 = vpack.c.bf16 %v1165_v8, %v1164_v35  ;;  %s2071_s9 = scalar_lea.vmem %s1644_s8, 256  ;;  %p2076_p9 = scmp.lt.s32.totalorder %s1644_s8, %s1644_s8 }
 0xbb0   :  { %p2072_p8 = scmp.ne.s32.totalorder %s1644_s8, %s2071_s9  ;;  %p2077_p10 = scmp.lt.s32.totalorder %s2071_s9, %s2071_s9 }
 0xbb2   :  { %p2078_p11 = por %p2077_p10, %p2076_p9 }
 0xbb4   :  { %p2079_p12 = pnand %p2078_p11, %p2072_p8 }
 0xbe8   :  { %v1140_v56 = vpop.xlane.xlu0 %1139 }
 0xbe9   :  { %2033 = vrcp.f32 %v1140_v56 }
 0xbec   :  { %v1143_v3 = vpop.xlane.xlu1 %1142 }
 0xbed   :  { %2035 = vrcp.f32 %v1143_v3 }
 0xbf0   :  { %v1146_v54 = vpop.xlane.xlu0 %1145  ;;  %v1149_v28 = vpop.xlane.xlu1 %1148 }
 0xbf1   :  { %2037 = vrcp.f32 %v1146_v54 }
 0xbf2   :  { %2039 = vrcp.f32 %v1149_v28 }
 0xbf3   :  { %v2034_v33 = vpop.eup %2033 }
 0xbf4   :  { %v1152_v31 = vpop.xlane.xlu0 %1151  ;;  %v1224_v32 = vpop.permute.xlu1 %1223  ;;  %v1166_v39 = vmul.f32 %v2034_v33, %v2018_v37 }
 0xbf5   :  { %1867 = vmatpush3.bf16.msra.mxu1 %v1224_v32  ;;  %2041 = vrcp.f32 %v1152_v31  ;;  %v1687_v31 = vld [vmem:[%s2481_s2 + $0x4] ss:$0 sm:$0xff] }
 0xbf6   :  { %1878 = vmatprep.subr.bf16.mxu1 %v2100_v15 }
 0xbf7   :  { %v2036_v34 = vpop.eup %2035 }
 0xbf8   :  { %v1167_v40 = vmul.f32 %v2036_v34, %v2020_v13  ;;  %v1177_v41 = vpop.permute.xlu0 %1176  ;;  %v1271_v46 = vpop.permute.xlu1 %1270 }
 0xbf9   :  { %1861 = vmatpush3.bf16.msra.mxu0 %v1177_v41 }
 0xbfa   :  { %v1173_v43 = vpack.c.bf16 %v1167_v40, %v1166_v39  ;;  %1872 = vmatprep.subr.bf16.mxu0 %v2100_v15 }
 0xbfb   :  { %v2038_v44 = vpop.eup %2037 }
 0xbfc   :  { %v2040_v45 = vpop.eup %2039  ;;  %1863 = vmatmul.mubr.msk.bf16.vlgmr.msra.gmra.mrb[28].mxu0 %vm343_vm3, %v1172_v42  ;;  %1869 = vmatmul.mubr.msk.bf16.vlgmr.msra.gmra.mrb[36].mxu1 %vm343_vm3, %v1173_v43  ;;  %v1168_v47 = vmul.f32 %v2038_v44, %v2024_v18 }
 0xbfd   :  { %1873 = vmatpush3.bf16.msra.mxu0 %v1271_v46  ;;  %1874 = vmatprep.mubr.msk.bf16.mxu0 %vm2101_vm1, %v2100_v15  ;;  %v1169_v48 = vmul.f32 %v2040_v45, %v2022_v17 }
 0xbfe   :  { %1880 = vmatprep.mubr.msk.bf16.mxu1 %vm2101_vm1, %v2100_v15  ;;  %1884 = vmatprep.subr.bf16.mxu0 %v2100_v15 }
 0xbff   :  { %v1174_v49 = vpack.c.bf16 %v1169_v48, %v1168_v47  ;;  %v2042_v52 = vpop.eup %2041 }
 0xc00   :  { %v1170_v55 = vmul.f32 %v2042_v52, %v2388_v21  ;;  %v1967_v52 = vld [vmem:[#allocation2 + $0x14] ss:$28 sps:$4 sm:$0xff]  }
 0xc04   :  { %1875 = vmatmul.mubr.msk.bf16.vlgmr.msra.gmra.mrb[32].mxu0 %vm343_vm3, %v1174_v49 }
 0xc05   :  { %1888 = vmatprep.mubr.msk.bf16.mxu0 %vm2101_vm1, %v2100_v15  ;;  %1885 = vmatpush3.bf16.msra.mxu0 %v1965_v4 }
 0xc06   :  { %1886 = vmatprep.subr.bf16.mxu0 %v2100_v15 }
 0xc09   :  { %1887 = vmatpush3.bf16.msra.mxu0 %v1966_v12 }
 0xc0a   :  { %1900 = vmatprep.subr.bf16.mxu0 %v2100_v15 }
 0xc29   :  { %v1155_v50 = vpop.xlane.xlu1 %1154 }
 0xc2a   :  { %2043 = vrcp.f32 %v1155_v50 }
 0xc2d   :  { %v1318_v51 = vpop.permute.xlu1 %1317 }
 0xc2e   :  { %1879 = vmatpush3.bf16.msra.mxu1 %v1318_v51 }
 0xc2f   :  { %1892 = vmatprep.subr.bf16.mxu1 %v2100_v15 }
 0xc34   :  { %v2044_v53 = vpop.eup %2043 }
 0xc35   :  { %v1171_v57 = vmul.f32 %v2044_v53, %v2028_v24  ;;  %v1968_v53 = vld [vmem:[#allocation2 + $0x4c] ss:$28 sps:$4 sm:$0xff]  }
 0xc37   :  { %v1175_v58 = vpack.c.bf16 %v1171_v57, %v1170_v55  ;;  %v1969_v55 = vld [vmem:[#allocation2 + $0x18] ss:$28 sps:$4 sm:$0xff]   ;;  %v1970_v57 = vld [vmem:[#allocation2 + $0x50] ss:$28 sps:$4 sm:$0xff]  }
 0xc39   :  { %1881 = vmatmul.mubr.msk.bf16.vlgmr.msra.gmra.mrb[40].mxu1 %vm343_vm3, %v1175_v58 }
 0xc3a   :  { %1896 = vmatprep.mubr.msk.bf16.mxu1 %vm2101_vm1, %v2100_v15  ;;  %1893 = vmatpush3.bf16.msra.mxu1 %v1967_v52 }
 0xc3b   :  { %1894 = vmatprep.subr.bf16.mxu1 %v2100_v15 }
 0xc3e   :  { %1895 = vmatpush3.bf16.msra.mxu1 %v1968_v53 }
 0xccf   :  { %v1216_v59 = vpop.f32.mrb[28].mxu0  ;;  %v1263_v60 = vpop.f32.mrb[36].mxu1 }
 0xcd0   :  { %v1864_v61 = vpop.f32.mrb[29].mxu0  ;;  %v1870_v62 = vpop.f32.mrb[37].mxu1 }
 0xcd1   :  { %v1219_v63 = vpop.f32.mrb[30].mxu0  ;;  %v1266_v2 = vpop.f32.mrb[38].mxu1 }
 0xcd2   :  { %v1942_v5 = vpack.i.bf16 %v1266_v2, %v1263_v60  ;;  %v1865_v6 = vpop.f32.mrb[31].mxu0  ;;  %v1871_v7 = vpop.f32.mrb[39].mxu1 }
 0xcd4   :  { %1943 = vrot.lane.b32.xlu0 %v1942_v5, %s2107_s13 }
 0xcd7   :  { %v1310_v36 = vpop.f32.mrb[32].mxu0 }
 0xcd8   :  { %v1876_v38 = vpop.f32.mrb[33].mxu0 }
 0xcd9   :  { %v1313_v9 = vpop.f32.mrb[34].mxu0  ;;  %v1972_v38 = vld [vmem:[#allocation2 + $0xc0] ss:$28 sps:$4 sm:$0xff]  }
 0xcda   :  { %v1947_v37 = vpack.i.bf16 %v1313_v9, %v1310_v36  ;;  %v1877_v10 = vpop.f32.mrb[35].mxu0  ;;  %v1971_v36 = vld [vmem:[#allocation2 + $0x88] ss:$28 sps:$4 sm:$0xff]  }
 0xcdb   :  { %v1691_v9 = vld [vmem:[%s2481_s2 + $0x5] ss:$0 sm:$0xff] }
 0xcdc   :  { %1948 = vrot.lane.b32.xlu1 %v1947_v37, %s2108_s14 }
 0xd0c   :  { %v1357_v13 = vpop.f32.mrb[40].mxu1 }
 0xd0d   :  { %v1882_v16 = vpop.f32.mrb[41].mxu1 }
 0xd0e   :  { %v1360_v17 = vpop.f32.mrb[42].mxu1 }
 0xd0f   :  { %v1952_v18 = vpack.i.bf16 %v1360_v17, %v1357_v13  ;;  %v1883_v19 = vpop.f32.mrb[43].mxu1 }
 0xd11   :  { %1953 = vrot.lane.b32.xlu0 %v1952_v18, %s2109_s15 }
 0xd46   :  { %v1944_v20 = vpop.permute.xlu0 %1943 }
 0xd47   :  { %v1946_v0 = vunpack.i.h.bf16 %v1944_v20  ;;  %v1945_v22 = vunpack.i.l.bf16 %v1944_v20 }
 0xd49   :  { %v1389_v25 = vsel %vm148_vm2, %v1219_v63, %v1946_v0  ;;  %v1388_v26 = vsel %vm148_vm2, %v1216_v59, %v1945_v22 }
 0xd4e   :  { %v1949_v21 = vpop.permute.xlu1 %1948 }
 0xd4f   :  { %v1951_v23 = vunpack.i.h.bf16 %v1949_v21  ;;  %v1950_v1 = vunpack.i.l.bf16 %v1949_v21 }
 0xd51   :  { %v1390_v3 = vsel %vm343_vm3, %v1388_v26, %v1950_v1  ;;  %v1391_v54 = vsel %vm343_vm3, %v1389_v25, %v1951_v23 }
 0xd83   :  { %v1954_v24 = vpop.permute.xlu0 %1953 }
 0xd84   :  { %v1956_v27 = vunpack.i.h.bf16 %v1954_v24  ;;  %v1955_v56 = vunpack.i.l.bf16 %v1954_v24 }
 0xd86   :  { %v1393_v28 = vsel %vm652_vm4, %v1391_v54, %v1956_v27  ;;  %v1392_v29 = vsel %vm652_vm4, %v1390_v3, %v1955_v56 }
 0xd87   :  { %v1394_v30 = vpack.c.bf16 %v1393_v28, %v1392_v29 }
 0xd89   :  { %1889 = vmatmul.mubr.msk.bf16.vlgmr.msra.gmra.mrb[36].mxu0 %vm39_vm0, %v1394_v30 }
 0xd8a   :  { %1908 = vmatprep.mubr.msk.bf16.mxu0 %vm2101_vm1, %v2100_v15  ;;  %1901 = vmatpush3.bf16.msra.mxu0 %v1969_v55 }
 0xd8b   :  { %1902 = vmatprep.subr.bf16.mxu0 %v2100_v15 }
 0xd8e   :  { %1903 = vmatpush3.bf16.msra.mxu0 %v1970_v57 }
 0xd8f   :  { %1904 = vmatprep.subr.bf16.mxu0 %v2100_v15 }
 0xd92   :  { %1905 = vmatpush3.bf16.msra.mxu0 %v1971_v36 }
 0xd93   :  { %1906 = vmatprep.subr.bf16.mxu0 %v2100_v15  ;;  %v1695_v15 = vld [vmem:[%s2481_s2 + $0x6] ss:$0 sm:$0xff] }
 0xd96   :  { %1907 = vmatpush3.bf16.msra.mxu0 %v1972_v38 }
 0xe5c   :  { %v1448_v32 = vpop.f32.mrb[36].mxu0 }
 0xe5d   :  { %v1449_v33 = vadd.f32 %v1687_v31, %v1448_v32  ;;  %v1890_v8 = vpop.f32.mrb[37].mxu0 }
 0xe5e   :  { %v1451_v34 = vpop.f32.mrb[38].mxu0 }
 0xe5f   :  { %v2438_v35 = vadd.f32 %v1449_v33, %v2286_v11  ;;  %v1452_v39 = vadd.f32 %v1687_v31, %v1451_v34  ;;  %v1891_v40 = vpop.f32.mrb[39].mxu0 }
 0xe61   :  { %v2441_v41 = vadd.f32 %v1452_v39, %v2289_v14  ;;  %v1457_v42 = vsel %vm39_vm0, %v2438_v35, 0.0 }
 0xe62   :  { %1458 = vadd.xlane.f32.xlu1 %v1457_v42 }
 0xe63   :  { %v1460_v43 = vsel %vm39_vm0, %v2441_v41, 0.0 }
 0xe64   :  { %1461 = vadd.xlane.f32.xlu0 %v1460_v43 }
 0xeef   :  { %v1459_v44 = vpop.xlane.xlu1 %1458 }
 0xef0   :  { %v1463_v45 = vmul.f32 0.03125, %v1459_v44 }
 0xef1   :  { %v1462_v46 = vpop.xlane.xlu0 %1461 }
 0xef2   :  { %v1465_v47 = vsub.f32 %v2438_v35, %v1463_v45  ;;  %v1464_v11 = vmul.f32 0.03125, %v1462_v46 }
 0xef4   :  { %v1466_v48 = vsub.f32 %v2441_v41, %v1464_v11  ;;  %v1467_v49 = vmul.f32 %v1465_v47, %v1465_v47 }
 0xef6   :  { %v1469_v14 = vsel %vm39_vm0, %v1467_v49, 0.0  ;;  %v1468_v50 = vmul.f32 %v1466_v48, %v1466_v48 }
 0xef7   :  { %1470 = vadd.xlane.f32.xlu0 %v1469_v14 }
 0xef8   :  { %v1472_v51 = vsel %vm39_vm0, %v1468_v50, 0.0 }
 0xefb   :  { %1473 = vadd.xlane.f32.xlu0 %v1472_v51 }
 0xf84   :  { %v1471_v58 = vpop.xlane.xlu0 %1470 }
 0xf85   :  { %v1475_v59 = vmul.f32 0.03125, %v1471_v58 }
 0xf87   :  { %v1477_v60 = vadd.f32 1e-06, %v1475_v59 }
 0xf88   :  { %v1474_v61 = vpop.xlane.xlu0 %1473 }
 0xf89   :  { %v1476_v62 = vmul.f32 0.03125, %v1474_v61  ;;  %2045 = vrsqrt.f32 %v1477_v60 }
 0xf8b   :  { %v1478_v63 = vadd.f32 1e-06, %v1476_v62 }
 0xf8d   :  { %2047 = vrsqrt.f32 %v1478_v63 }
 0xf93   :  { %v2046_v2 = vpop.eup %2045 }
 0xf94   :  { %v1481_v5 = vmul.f32 %v2046_v2, %v1465_v47 }
 0xf97   :  { %v2048_v4 = vpop.eup %2047 }
 0xf98   :  { %v1482_v6 = vmul.f32 %v2048_v4, %v1466_v48 }
 0xf9a   :  { %v1483_v7 = vpack.c.bf16 %v1482_v6, %v1481_v5 }
 0xf9c   :  { %1897 = vmatmul.mubr.msk.bf16.vlgmr.msra.gmra.mrb[44].mxu1 %vm39_vm0, %v1483_v7 }
0x106f   :  { %v1542_v37 = vpop.f32.mrb[44].mxu1 }
0x1070   :  { %v1543_v10 = vadd.f32 %v1691_v9, %v1542_v37  ;;  %v1898_v12 = vpop.f32.mrb[45].mxu1 }
0x1071   :  { %v1545_v13 = vpop.f32.mrb[46].mxu1 }
0x1072   :  { %v1546_v16 = vadd.f32 %v1691_v9, %v1545_v13  ;;  %v1899_v17 = vpop.f32.mrb[47].mxu1  ;;  %v1549_v18 = vmax.f32 %v1543_v10, 0.0 }
0x1074   :  { %v1550_v19 = vmax.f32 %v1546_v16, 0.0 }
0x1076   :  { %v1551_v20 = vpack.c.bf16 %v1550_v19, %v1549_v18 }
0x1078   :  { %1909 = vmatmul.mubr.msk.bf16.vlgmr.msra.gmra.mrb[40].mxu0 %vm1589_vm5, %v1551_v20 }
0x114b   :  { %v1627_v21 = vpop.f32.mrb[40].mxu0 }
0x114c   :  { %v1628_v0 = vadd.f32 %v1695_v15, %v1627_v21  ;;  %v1910_v22 = vpop.f32.mrb[41].mxu0 }
0x114d   :  { %v1630_v23 = vpop.f32.mrb[42].mxu0 }
0x114e   :  { %v1634_v1 = vadd.f32 %v1628_v0, %v2438_v35  ;;  %v1631_v24 = vadd.f32 %v1695_v15, %v1630_v23  ;;  %v1911_v25 = vpop.f32.mrb[43].mxu0 }
0x1150   :  { %1636 = vst.msk [vmem:[#allocation5] sm:$0xff] %vm39_vm0, %v1634_v1  ;;  %v1635_v26 = vadd.f32 %v1631_v24, %v2441_v41 }
0x1152   :  { %1637 = vst.msk [vmem:[#allocation5 + $0x8] sm:$0xff] %vm39_vm0, %v1635_v26 }
0x1153   :  { %2082 = shalt.err (!%p2079_p12)
}
0x1154   :  { %s2083_s11 = scalar_lea.hbm %s2482_s3, 256 }
0x1155   :  { %p2084_p13 = scmp.ne.s32.totalorder %s2482_s3, %s2083_s11  ;;  %p2087_p0 = scmp.lt.u32.totalorder %s2083_s11, %s2482_s3 }
0x1157   :  { %p2089_p1 = pnand %p2087_p0, %p2084_p13 }
0x1159   :  { %2092 = shalt.err (!%p2089_p1)
}
0x115a   :  { %s2111_s17 = smov 128  }
0x115b   :  { %1649 = dma.vmem_to_hbm [thread:$0]  %s1644_s8, 256, %s2482_s3, [#allocation4], %s2111_s17, %s2111_s17, %s2107_s13  }
0x115c   :  { %2095 = dma.done.wait [#allocation4], 256  }
0x115d   :  { %2096 = vsyncadd [#allocation4], 4294967040 }
0x115e   :  { %1653 = vsyncpa [#allocation3], 1 }
0x115f   :  { %1654 = vsyncpa [#allocation4], 1 }

</bundles_post_ra>
